<compile_context>
chip_gen: v7x
topology: tpu7x:2x2x1
jax: 0.10.0
libtpu: 0.0.40
codegen_flags: <defaults>
</compile_context>

<pallas_src>
import functools
import math

import jax
import jax.numpy as jnp
from jax.experimental import pallas as pl
from jax.experimental.pallas import tpu as pltpu


# -----------------------------------------------------------------------------
# Kernel 1a: fused node projection   [B*N, D] @ [D, 3D]  ->  K, V, K'  (bf16)
# -----------------------------------------------------------------------------
def _node_proj_kernel(x_ref, w_ref, k_ref, v_ref, l_ref):
    D = x_ref.shape[-1]
    proj = jnp.dot(x_ref[...], w_ref[...], preferred_element_type=jnp.float32)
    k_ref[...] = proj[:, :D].astype(k_ref.dtype)
    v_ref[...] = proj[:, D:2 * D].astype(v_ref.dtype)
    l_ref[...] = proj[:, 2 * D:].astype(l_ref.dtype)


# -----------------------------------------------------------------------------
# Kernel 1b: graph context  W_gc * mean_n(h)   (tiny batched pass)
# -----------------------------------------------------------------------------
def _make_graph_ctx_kernel(batch_tile):
    def kernel(emb_ref, w_ref, out_ref):
        rows = [jnp.mean(emb_ref[b], axis=0, keepdims=True)        # [1, D]
                for b in range(batch_tile)]
        ge = jnp.concatenate(rows, axis=0)                         # [Bt, D]
        out_ref[...] = jnp.dot(ge, w_ref[...],
                               preferred_element_type=jnp.float32)
    return kernel


def precompute(embeddings, w_node, w_fixed, *, row_tile=256, batch_tile=8):
    """Returns graph_context [B, D] f32 and K/V/K' as [B, D, N] bfloat16."""
    B, N, D = embeddings.shape
    total = B * N
    R = min(row_tile, total)
    assert total % R == 0, "row_tile must divide B*N"
    Bt = min(batch_tile, B)
    assert B % Bt == 0, "batch_tile must divide B"

    flat = embeddings.reshape(total, D)
    k_flat, v_flat, l_flat = pl.pallas_call(
        _node_proj_kernel,
        grid=(total // R,),
        in_specs=[pl.BlockSpec((R, D), lambda i: (i, 0)),
                  pl.BlockSpec((D, 3 * D), lambda i: (0, 0))],
        out_specs=(pl.BlockSpec((R, D), lambda i: (i, 0)),
                   pl.BlockSpec((R, D), lambda i: (i, 0)),
                   pl.BlockSpec((R, D), lambda i: (i, 0))),
        out_shape=(jax.ShapeDtypeStruct((total, D), jnp.bfloat16),) * 3,
        compiler_params=pltpu.CompilerParams(dimension_semantics=("parallel",)),
    )(flat, w_node)

    graph_context = pl.pallas_call(
        _make_graph_ctx_kernel(Bt),
        grid=(B // Bt,),
        in_specs=[pl.BlockSpec((Bt, N, D), lambda i: (i, 0, 0)),
                  pl.BlockSpec((D, D), lambda i: (0, 0))],
        out_specs=pl.BlockSpec((Bt, D), lambda i: (i, 0)),
        out_shape=jax.ShapeDtypeStruct((B, D), jnp.float32),
        compiler_params=pltpu.CompilerParams(dimension_semantics=("parallel",)),
    )(embeddings, w_fixed)

    # one-time layout change (XLA) to the decode-friendly [B, D, N] layout
    def to_decode_layout(p):
        return jnp.swapaxes(p.reshape(B, N, D), 1, 2)

    return (graph_context, to_decode_layout(k_flat),
            to_decode_layout(v_flat), to_decode_layout(l_flat))


# -----------------------------------------------------------------------------
# Kernel 2: full greedy decode.  One grid step = Bt batch rows; all T steps run
# inside the kernel with K/V/K' resident in VMEM, the visited mask in a VMEM
# scratch, and the greedy argmax + mask update done in-kernel.
# -----------------------------------------------------------------------------
def _make_decode_kernel(T, Bt, n_heads, tanh_clipping):
    def kernel(gctx_ref, ctx_ref, kT_ref, vT_ref, lkT_ref, mask0_ref,
               w_step_ref, w_outT_ref, s_ref, sT_ref,
               logp_ref, pi_ref, mask_sc):
        D = kT_ref.shape[1]
        N = kT_ref.shape[2]
        dh = D // n_heads
        inv_sqrt_dh = 1.0 / math.sqrt(dh)
        inv_sqrt_d = 1.0 / math.sqrt(D)
        NEG = -1e9

        S = s_ref[...]              # [D, H]  S[d, h] = 1  iff head(d) == h
        S_T = sT_ref[...]           # [H, D]
        W_step = w_step_ref[...]    # [Cdim, D]
        W_outT = w_outT_ref[...]    # [D, D]  (W_out transposed on the host)
        gctx = gctx_ref[...]        # [Bt, D]

        mask_sc[...] = mask0_ref[...]          # visited mask, stays in VMEM

        @pl.loop(0, T)
        def _step(t):
            mask_val = mask_sc[...]                                     # [Bt, N]
            ctx_t = ctx_ref[t]                                          # [Bt, Cdim]
            # q = W_gc h_bar + W_sc Context(s, h)
            q_all = gctx + jnp.dot(ctx_t, W_step,
                                   preferred_element_type=jnp.float32)  # [Bt, D]

            rows = []
            for b in range(Bt):                 # unrolled; all operands in VMEM
                qb = q_all[b:b + 1, :]                                  # [1, D]
                m_b = mask_val[b:b + 1, :]                              # [1, N]
                KT_b = kT_ref[b].astype(jnp.float32)                    # [D, N]
                VT_b = vT_ref[b].astype(jnp.float32)                    # [D, N]
                LKT_b = lkT_ref[b].astype(jnp.float32)                  # [D, N]

                # ---- multi-head glimpse; scores kept in [H, N] (N on lanes)
                qS = S_T * qb                                           # [H, D]
                sc = jnp.dot(qS, KT_b,
                             preferred_element_type=jnp.float32) * inv_sqrt_dh
                sc = jnp.where(m_b > 0, NEG, sc)                        # [H, N]
                smax = jnp.max(sc, axis=-1, keepdims=True)              # [H, 1]
                p = jnp.exp(sc - smax)
                denom = jnp.sum(p, axis=-1, keepdims=True)              # [H, 1]
                attn = p * pl.reciprocal(denom, approx=True)            # [H, N]
                # heads[d] = sum_n attn[head(d), n] * V[n, d]
                heads_dn = jnp.dot(S, attn,
                                   preferred_element_type=jnp.float32) * VT_b
                h_col = jnp.sum(heads_dn, axis=-1, keepdims=True)       # [D, 1]
                g_col = jnp.dot(W_outT, h_col,
                                preferred_element_type=jnp.float32)     # [D, 1]

                # ---- pointer logits, lane-dense [1, N] row
                lrow = jnp.sum(LKT_b * g_col, axis=0,
                               keepdims=True) * inv_sqrt_d              # [1, N]
                rows.append(lrow)

            logits = jnp.concatenate(rows, axis=0)                      # [Bt, N]
            logits = tanh_clipping * jnp.tanh(logits)
            logits = jnp.where(mask_val > 0, NEG, logits)
            lmax = jnp.max(logits, axis=-1, keepdims=True)
            lse = lmax + jnp.log(jnp.sum(jnp.exp(logits - lmax),
                                         axis=-1, keepdims=True))
            log_p = logits - lse
            logp_ref[t] = log_p

            # ---- greedy decoding + visited-mask update, fully in-kernel
            iota = jax.lax.broadcasted_iota(jnp.int32, (Bt, N), 1)
            rmax = jnp.max(log_p, axis=-1, keepdims=True)
            idx = jnp.min(jnp.where(log_p >= rmax, iota, N),
                          axis=-1, keepdims=True)                       # [Bt, 1]
            pi_ref[t] = idx
            onehot = (iota == idx).astype(jnp.float32)
            mask_sc[...] = jnp.maximum(mask_val, onehot)

    return kernel


def decode_greedy(graph_context, contexts, glimpse_kT, glimpse_vT, logit_kT,
                  mask0, w_step, w_out, *, n_heads, tanh_clipping,
                  batch_tile=8):
    """Full greedy autoregressive decode in a single pallas_call.

    contexts:  [T, B, step_context_dim]  (problem-specific Context(s, h))
    *_kT/_vT:  [B, D, N] bfloat16 from `precompute`
    mask0:     [B, N] f32, 1.0 == infeasible
    Returns (log_ps [B, T, N], pi [B, T]).
    """
    T, B, Cdim = contexts.shape
    _, D, N = glimpse_kT.shape
    H = n_heads
    dh = D // H
    Bt = min(batch_tile, B)
    assert B % Bt == 0, "batch_tile must divide B"

    # static head-selection matrices, pre-transposed output projection
    S = jnp.repeat(jnp.eye(H, dtype=jnp.float32), dh, axis=0)      # [D, H]
    S_T = jnp.transpose(S)                                         # [H, D]
    w_outT = jnp.transpose(w_out)                                  # [D, D]

    kernel = _make_decode_kernel(int(T), int(Bt), int(H), float(tanh_clipping))
    logp_tbn, pi_tb1 = pl.pallas_call(
        kernel,
        grid=(B // Bt,),
        in_specs=[
            pl.BlockSpec((Bt, D), lambda g: (g, 0)),            # graph_context
            pl.BlockSpec((T, Bt, Cdim), lambda g: (0, g, 0)),   # step contexts
            pl.BlockSpec((Bt, D, N), lambda g: (g, 0, 0)),      # K^T   (bf16)
            pl.BlockSpec((Bt, D, N), lambda g: (g, 0, 0)),      # V^T   (bf16)
            pl.BlockSpec((Bt, D, N), lambda g: (g, 0, 0)),      # K'^T  (bf16)
            pl.BlockSpec((Bt, N), lambda g: (g, 0)),            # initial mask
            pl.BlockSpec((Cdim, D), lambda g: (0, 0)),          # W_step_context
            pl.BlockSpec((D, D), lambda g: (0, 0)),             # W_out^T
            pl.BlockSpec((D, H), lambda g: (0, 0)),             # head select S
            pl.BlockSpec((H, D), lambda g: (0, 0)),             # S^T
        ],
        out_specs=(pl.BlockSpec((T, Bt, N), lambda g: (0, g, 0)),
                   pl.BlockSpec((T, Bt, 1), lambda g: (0, g, 0))),
        out_shape=(jax.ShapeDtypeStruct((T, B, N), jnp.float32),
                   jax.ShapeDtypeStruct((T, B, 1), jnp.int32)),
        scratch_shapes=[pltpu.VMEM((Bt, N), jnp.float32)],
        # Per-block VMEM residency ~ 3*Bt*D*N*2B + T*Bt*Cdim*4B + weights:
        # far below the 16/32 MiB default scoped limits (v5e/v6e/v7x) here;
        # raise vmem_limit_bytes for very large graph sizes.
        compiler_params=pltpu.CompilerParams(dimension_semantics=("parallel",)),
    )(graph_context, contexts, glimpse_kT, glimpse_vT, logit_kT, mask0,
      w_step, w_outT, S, S_T)

    log_ps = jnp.transpose(logp_tbn, (1, 0, 2))    # [B, T, N]
    pi = jnp.transpose(pi_tb1[:, :, 0], (1, 0))    # [B, T]
    return log_ps, pi


# -----------------------------------------------------------------------------
# Pure-JAX references (correctness check only)
# -----------------------------------------------------------------------------
def ref_precompute(emb, w_node, w_fixed):
    D = emb.shape[-1]
    ge = emb.mean(axis=1)                          # [B, D]
    gctx = ge @ w_fixed                            # [B, D]
    proj = emb @ w_node                            # [B, N, 3D]
    return gctx, proj[..., :D], proj[..., D:2 * D], proj[..., 2 * D:]


def ref_step(gctx, ctx, K, V, Klog, mask, w_step, w_out, n_heads, C):
    B, N, D = K.shape
    H = n_heads
    dh = D // H
    q = gctx + ctx @ w_step                                         # [B, D]
    qh = q.reshape(B, H, dh)
    Kh = K.reshape(B, N, H, dh).transpose(0, 2, 1, 3)               # [B, H, N, dh]
    Vh = V.reshape(B, N, H, dh).transpose(0, 2, 1, 3)
    sc = jnp.einsum('bhd,bhnd->bhn', qh, Kh) / math.sqrt(dh)
    sc = jnp.where(mask[:, None, :] > 0, -1e9, sc)
    attn = jax.nn.softmax(sc, axis=-1)
    heads = jnp.einsum('bhn,bhnd->bhd', attn, Vh).reshape(B, D)
    glimpse = heads @ w_out
    logits = jnp.einsum('bd,bnd->bn', glimpse, Klog) / math.sqrt(D)
    logits = C * jnp.tanh(logits)
    logits = jnp.where(mask > 0, -1e9, logits)
    return jax.nn.log_softmax(logits, axis=-1), glimpse


# -----------------------------------------------------------------------------
if __name__ == "__main__":
    B, N, D, H = 16, 16, 128, 8
    step_context_dim = 2 * D
    tanh_clipping = 10.0
    T = 4                                  # decoding steps to run

    key = jax.random.PRNGKey(0)
    ks = jax.random.split(key, 6)
    embeddings = jax.random.normal(ks[0], (B, N, D), jnp.float32)
    # synthetic parameters for the three bias-free Linear layers, stored [in, out]
    w_node = jax.random.normal(ks[1], (D, 3 * D), jnp.float32) / math.sqrt(D)
    w_fixed = jax.random.normal(ks[2], (D, D), jnp.float32) / math.sqrt(D)
    w_step = jax.random.normal(ks[3], (step_context_dim, D),
                               jnp.float32) / math.sqrt(step_context_dim)
    w_out = jax.random.normal(ks[4], (D, D), jnp.float32) / math.sqrt(D)

    # TODO(synk): Context(s,h), DynamicEmbedding(s) and the mask-update rule are
    # problem-specific; here step contexts are synthesized, dynamic K/V/K' terms
    # are zero, the mask rule is "mark the visited node", decode type = greedy.
    contexts = jax.random.normal(ks[5], (T, B, step_context_dim), jnp.float32)
    mask0 = jnp.zeros((B, N), jnp.float32)

    # ---- precompute (Pallas) ----
    pre_fn = jax.jit(functools.partial(precompute, row_tile=128, batch_tile=8))
    gctx, kT, vT, lkT = pre_fn(embeddings, w_node, w_fixed)
    jax.block_until_ready((gctx, kT, vT, lkT))

    rg, rk, rv, rl = ref_precompute(embeddings, w_node, w_fixed)
    assert jnp.allclose(gctx, rg, rtol=1e-3, atol=1e-3), "graph_context mismatch"
    for got_t, want in ((kT, rk), (vT, rv), (lkT, rl)):
        got = jnp.swapaxes(got_t.astype(jnp.float32), 1, 2)
        assert jnp.allclose(got, want, rtol=3e-2, atol=3e-2), "projection mismatch"

    # ---- full greedy decode (one Pallas call; K/V/K' stay in VMEM) ----
    dec_fn = jax.jit(functools.partial(decode_greedy, n_heads=H,
                                       tanh_clipping=tanh_clipping,
                                       batch_tile=8))
    log_ps, pi = dec_fn(gctx, contexts, kT, vT, lkT, mask0, w_step, w_out)
    jax.block_until_ready((log_ps, pi))

    # ---- step-by-step reference check along the kernel's action trajectory ----
    Kr = jnp.swapaxes(kT.astype(jnp.float32), 1, 2)   # bf16-rounded tensors the
    Vr = jnp.swapaxes(vT.astype(jnp.float32), 1, 2)   # kernel actually consumed
    Lr = jnp.swapaxes(lkT.astype(jnp.float32), 1, 2)
    mask_cur = mask0
    rows_idx = jnp.arange(B)
    for t in range(T):
        r_logp, _ = ref_step(rg, contexts[t], Kr, Vr, Lr, mask_cur,
                             w_step, w_out, H, tanh_clipping)
        p_kernel = jnp.exp(log_ps[:, t, :])
        p_ref = jnp.exp(r_logp)
        assert jnp.allclose(p_kernel, p_ref, rtol=1e-2, atol=1e-2), \
            f"log_p mismatch at step {t}"
        assert jnp.allclose(jnp.sum(p_kernel, axis=-1), 1.0, atol=1e-4), \
            "probabilities do not sum to 1"
        assert float(jnp.max(p_kernel * mask_cur)) < 1e-6, \
            "masked node received probability mass"
        sel = pi[:, t]
        assert not bool(jnp.any(mask_cur[rows_idx, sel] > 0)), \
            "greedy picked an infeasible action"
        mask_cur = mask_cur.at[rows_idx, sel].set(1.0)

    jax.block_until_ready((log_ps, pi))
    print("KERNEL_OK")
</pallas_src>

<mosaic_0001>
module attributes {stable_mosaic.version = 11 : i64} {
  func.func @_node_proj_kernel(%arg0: i32, %arg1: memref<128x128xf32, #tpu.memory_space<vmem>>, %arg2: memref<128x384xf32, #tpu.memory_space<vmem>>, %arg3: memref<128x128xbf16, #tpu.memory_space<vmem>>, %arg4: memref<128x128xbf16, #tpu.memory_space<vmem>>, %arg5: memref<128x128xbf16, #tpu.memory_space<vmem>>) attributes {dimension_semantics = [#tpu.dimension_semantics<parallel>], iteration_bounds = array<i64: 2>, scalar_prefetch = 0 : i64, scratch_operands = 0 : i64, tpu.core_type = #tpu.core_type<tc>, window_params = [{transform_indices = @transform_0, window_bounds = array<i64: 128, 128>}, {pipeline_mode = #tpu.pipeline_mode<synchronous>, transform_indices = @transform_1, window_bounds = array<i64: 128, 384>}, {transform_indices = @transform_2, window_bounds = array<i64: 128, 128>}, {transform_indices = @transform_3, window_bounds = array<i64: 128, 128>}, {transform_indices = @transform_4, window_bounds = array<i64: 128, 128>}]} {
    %c0 = arith.constant 0 : index
    %c0_0 = arith.constant 0 : index
    %0 = vector.load %arg1[%c0, %c0_0] : memref<128x128xf32, #tpu.memory_space<vmem>>, vector<128x128xf32>
    %c0_1 = arith.constant 0 : index
    %c0_2 = arith.constant 0 : index
    %1 = vector.load %arg2[%c0_1, %c0_2] : memref<128x384xf32, #tpu.memory_space<vmem>>, vector<128x384xf32>
    %cst = arith.constant dense<0.000000e+00> : vector<128x384xf32>
    %2 = tpu.matmul %0, %1, %cst {dimension_numbers = #tpu.dot_dimension_numbers<[1], [0], [0], [1], [0, 0, 1, 1], [], []>} : vector<128x128xf32>, vector<128x384xf32>, vector<128x384xf32> -> vector<128x384xf32>
    %3 = vector.extract_strided_slice %2 {offsets = [0, 0], sizes = [128, 128], strides = [1, 1]} : vector<128x384xf32> to vector<128x128xf32>
    %4 = arith.truncf %3 : vector<128x128xf32> to vector<128x128xbf16>
    %c0_3 = arith.constant 0 : index
    %c0_4 = arith.constant 0 : index
    %5 = vector.load %arg3[%c0_3, %c0_4] : memref<128x128xbf16, #tpu.memory_space<vmem>>, vector<128x128xbf16>
    tpu.vector_store %arg3[%c0_3, %c0_4], %4 {strides = array<i32>} : memref<128x128xbf16, #tpu.memory_space<vmem>>, vector<128x128xbf16>,
    %6 = vector.extract_strided_slice %2 {offsets = [0, 128], sizes = [128, 128], strides = [1, 1]} : vector<128x384xf32> to vector<128x128xf32>
    %7 = arith.truncf %6 : vector<128x128xf32> to vector<128x128xbf16>
    %c0_5 = arith.constant 0 : index
    %c0_6 = arith.constant 0 : index
    %8 = vector.load %arg4[%c0_5, %c0_6] : memref<128x128xbf16, #tpu.memory_space<vmem>>, vector<128x128xbf16>
    tpu.vector_store %arg4[%c0_5, %c0_6], %7 {strides = array<i32>} : memref<128x128xbf16, #tpu.memory_space<vmem>>, vector<128x128xbf16>,
    %9 = vector.extract_strided_slice %2 {offsets = [0, 256], sizes = [128, 128], strides = [1, 1]} : vector<128x384xf32> to vector<128x128xf32>
    %10 = arith.truncf %9 : vector<128x128xf32> to vector<128x128xbf16>
    %c0_7 = arith.constant 0 : index
    %c0_8 = arith.constant 0 : index
    %11 = vector.load %arg5[%c0_7, %c0_8] : memref<128x128xbf16, #tpu.memory_space<vmem>>, vector<128x128xbf16>
    tpu.vector_store %arg5[%c0_7, %c0_8], %10 {strides = array<i32>} : memref<128x128xbf16, #tpu.memory_space<vmem>>, vector<128x128xbf16>,
    return
  }
  func.func @transform_0(%arg0: i32) -> (i32, i32) {
    %c0_i32 = arith.constant 0 : i32
    %c0_i32_0 = arith.constant 0 : i32
    return %arg0, %c0_i32 : i32, i32
  }
  func.func @transform_1(%arg0: i32) -> (i32, i32) {
    %c0_i32 = arith.constant 0 : i32
    %c0_i32_0 = arith.constant 0 : i32
    %c0_i32_1 = arith.constant 0 : i32
    return %c0_i32, %c0_i32_0 : i32, i32
  }
  func.func @transform_2(%arg0: i32) -> (i32, i32) {
    %c0_i32 = arith.constant 0 : i32
    %c0_i32_0 = arith.constant 0 : i32
    return %arg0, %c0_i32 : i32, i32
  }
  func.func @transform_3(%arg0: i32) -> (i32, i32) {
    %c0_i32 = arith.constant 0 : i32
    %c0_i32_0 = arith.constant 0 : i32
    return %arg0, %c0_i32 : i32, i32
  }
  func.func @transform_4(%arg0: i32) -> (i32, i32) {
    %c0_i32 = arith.constant 0 : i32
    %c0_i32_0 = arith.constant 0 : i32
    return %arg0, %c0_i32 : i32, i32
  }
}

module attributes {stable_mosaic.version = 11 : i64} {
  func.func @kernel(%arg0: i32, %arg1: memref<8x16x128xf32, #tpu.memory_space<vmem>>, %arg2: memref<128x128xf32, #tpu.memory_space<vmem>>, %arg3: memref<8x128xf32, #tpu.memory_space<vmem>>) attributes {dimension_semantics = [#tpu.dimension_semantics<parallel>], iteration_bounds = array<i64: 2>, scalar_prefetch = 0 : i64, scratch_operands = 0 : i64, tpu.core_type = #tpu.core_type<tc>, window_params = [{transform_indices = @transform_0, window_bounds = array<i64: 8, 16, 128>}, {pipeline_mode = #tpu.pipeline_mode<synchronous>, transform_indices = @transform_1, window_bounds = array<i64: 128, 128>}, {transform_indices = @transform_2, window_bounds = array<i64: 8, 128>}]} {
    %c0 = arith.constant 0 : index
    %c0_0 = arith.constant 0 : index
    %c0_1 = arith.constant 0 : index
    %0 = vector.load %arg1[%c0, %c0_0, %c0_1] : memref<8x16x128xf32, #tpu.memory_space<vmem>>, vector<1x16x128xf32>
    %1 = vector.shape_cast %0 : vector<1x16x128xf32> to vector<16x128xf32>
    %cst = arith.constant dense<0.000000e+00> : vector<128xf32>
    %2 = vector.multi_reduction <add>, %1, %cst [0] : vector<16x128xf32> to vector<128xf32>
    %3 = vector.shape_cast %2 : vector<128xf32> to vector<1x128xf32>
    %cst_2 = arith.constant 1.600000e+01 : f32
    %4 = vector.broadcast %cst_2 : f32 to vector<1x128xf32>
    %5 = arith.divf %3, %4 : vector<1x128xf32>
    %c1 = arith.constant 1 : index
    %c0_3 = arith.constant 0 : index
    %c0_4 = arith.constant 0 : index
    %6 = vector.load %arg1[%c1, %c0_3, %c0_4] : memref<8x16x128xf32, #tpu.memory_space<vmem>>, vector<1x16x128xf32>
    %7 = vector.shape_cast %6 : vector<1x16x128xf32> to vector<16x128xf32>
    %cst_5 = arith.constant dense<0.000000e+00> : vector<128xf32>
    %8 = vector.multi_reduction <add>, %7, %cst_5 [0] : vector<16x128xf32> to vector<128xf32>
    %9 = vector.shape_cast %8 : vector<128xf32> to vector<1x128xf32>
    %cst_6 = arith.constant 1.600000e+01 : f32
    %10 = vector.broadcast %cst_6 : f32 to vector<1x128xf32>
    %11 = arith.divf %9, %10 : vector<1x128xf32>
    %c2 = arith.constant 2 : index
    %c0_7 = arith.constant 0 : index
    %c0_8 = arith.constant 0 : index
    %12 = vector.load %arg1[%c2, %c0_7, %c0_8] : memref<8x16x128xf32, #tpu.memory_space<vmem>>, vector<1x16x128xf32>
    %13 = vector.shape_cast %12 : vector<1x16x128xf32> to vector<16x128xf32>
    %cst_9 = arith.constant dense<0.000000e+00> : vector<128xf32>
    %14 = vector.multi_reduction <add>, %13, %cst_9 [0] : vector<16x128xf32> to vector<128xf32>
    %15 = vector.shape_cast %14 : vector<128xf32> to vector<1x128xf32>
    %cst_10 = arith.constant 1.600000e+01 : f32
    %16 = vector.broadcast %cst_10 : f32 to vector<1x128xf32>
    %17 = arith.divf %15, %16 : vector<1x128xf32>
    %c3 = arith.constant 3 : index
    %c0_11 = arith.constant 0 : index
    %c0_12 = arith.constant 0 : index
    %18 = vector.load %arg1[%c3, %c0_11, %c0_12] : memref<8x16x128xf32, #tpu.memory_space<vmem>>, vector<1x16x128xf32>
    %19 = vector.shape_cast %18 : vector<1x16x128xf32> to vector<16x128xf32>
    %cst_13 = arith.constant dense<0.000000e+00> : vector<128xf32>
    %20 = vector.multi_reduction <add>, %19, %cst_13 [0] : vector<16x128xf32> to vector<128xf32>
    %21 = vector.shape_cast %20 : vector<128xf32> to vector<1x128xf32>
    %cst_14 = arith.constant 1.600000e+01 : f32
    %22 = vector.broadcast %cst_14 : f32 to vector<1x128xf32>
    %23 = arith.divf %21, %22 : vector<1x128xf32>
    %c4 = arith.constant 4 : index
    %c0_15 = arith.constant 0 : index
    %c0_16 = arith.constant 0 : index
    %24 = vector.load %arg1[%c4, %c0_15, %c0_16] : memref<8x16x128xf32, #tpu.memory_space<vmem>>, vector<1x16x128xf32>
    %25 = vector.shape_cast %24 : vector<1x16x128xf32> to vector<16x128xf32>
    %cst_17 = arith.constant dense<0.000000e+00> : vector<128xf32>
    %26 = vector.multi_reduction <add>, %25, %cst_17 [0] : vector<16x128xf32> to vector<128xf32>
    %27 = vector.shape_cast %26 : vector<128xf32> to vector<1x128xf32>
    %cst_18 = arith.constant 1.600000e+01 : f32
    %28 = vector.broadcast %cst_18 : f32 to vector<1x128xf32>
    %29 = arith.divf %27, %28 : vector<1x128xf32>
    %c5 = arith.constant 5 : index
    %c0_19 = arith.constant 0 : index
    %c0_20 = arith.constant 0 : index
    %30 = vector.load %arg1[%c5, %c0_19, %c0_20] : memref<8x16x128xf32, #tpu.memory_space<vmem>>, vector<1x16x128xf32>
    %31 = vector.shape_cast %30 : vector<1x16x128xf32> to vector<16x128xf32>
    %cst_21 = arith.constant dense<0.000000e+00> : vector<128xf32>
    %32 = vector.multi_reduction <add>, %31, %cst_21 [0] : vector<16x128xf32> to vector<128xf32>
    %33 = vector.shape_cast %32 : vector<128xf32> to vector<1x128xf32>
    %cst_22 = arith.constant 1.600000e+01 : f32
    %34 = vector.broadcast %cst_22 : f32 to vector<1x128xf32>
    %35 = arith.divf %33, %34 : vector<1x128xf32>
    %c6 = arith.constant 6 : index
    %c0_23 = arith.constant 0 : index
    %c0_24 = arith.constant 0 : index
    %36 = vector.load %arg1[%c6, %c0_23, %c0_24] : memref<8x16x128xf32, #tpu.memory_space<vmem>>, vector<1x16x128xf32>
    %37 = vector.shape_cast %36 : vector<1x16x128xf32> to vector<16x128xf32>
    %cst_25 = arith.constant dense<0.000000e+00> : vector<128xf32>
    %38 = vector.multi_reduction <add>, %37, %cst_25 [0] : vector<16x128xf32> to vector<128xf32>
    %39 = vector.shape_cast %38 : vector<128xf32> to vector<1x128xf32>
    %cst_26 = arith.constant 1.600000e+01 : f32
    %40 = vector.broadcast %cst_26 : f32 to vector<1x128xf32>
    %41 = arith.divf %39, %40 : vector<1x128xf32>
    %c7 = arith.constant 7 : index
    %c0_27 = arith.constant 0 : index
    %c0_28 = arith.constant 0 : index
    %42 = vector.load %arg1[%c7, %c0_27, %c0_28] : memref<8x16x128xf32, #tpu.memory_space<vmem>>, vector<1x16x128xf32>
    %43 = vector.shape_cast %42 : vector<1x16x128xf32> to vector<16x128xf32>
    %cst_29 = arith.constant dense<0.000000e+00> : vector<128xf32>
    %44 = vector.multi_reduction <add>, %43, %cst_29 [0] : vector<16x128xf32> to vector<128xf32>
    %45 = vector.shape_cast %44 : vector<128xf32> to vector<1x128xf32>
    %cst_30 = arith.constant 1.600000e+01 : f32
    %46 = vector.broadcast %cst_30 : f32 to vector<1x128xf32>
    %47 = arith.divf %45, %46 : vector<1x128xf32>
    %48 = tpu.concatenate %5, %11, %17, %23, %29, %35, %41, %47 in 0 : vector<1x128xf32>, vector<1x128xf32>, vector<1x128xf32>, vector<1x128xf32>, vector<1x128xf32>, vector<1x128xf32>, vector<1x128xf32>, vector<1x128xf32> -> vector<8x128xf32>
    %c0_31 = arith.constant 0 : index
    %c0_32 = arith.constant 0 : index
    %49 = vector.load %arg2[%c0_31, %c0_32] : memref<128x128xf32, #tpu.memory_space<vmem>>, vector<128x128xf32>
    %cst_33 = arith.constant dense<0.000000e+00> : vector<8x128xf32>
    %50 = tpu.matmul %48, %49, %cst_33 {dimension_numbers = #tpu.dot_dimension_numbers<[1], [0], [0], [1], [0, 0, 1, 1], [], []>} : vector<8x128xf32>, vector<128x128xf32>, vector<8x128xf32> -> vector<8x128xf32>
    %c0_34 = arith.constant 0 : index
    %c0_35 = arith.constant 0 : index
    %51 = vector.load %arg3[%c0_34, %c0_35] : memref<8x128xf32, #tpu.memory_space<vmem>>, vector<8x128xf32>
    tpu.vector_store %arg3[%c0_34, %c0_35], %50 {strides = array<i32>} : memref<8x128xf32, #tpu.memory_space<vmem>>, vector<8x128xf32>,
    return
  }
  func.func @transform_0(%arg0: i32) -> (i32, i32, i32) {
    %c0_i32 = arith.constant 0 : i32
    %c0_i32_0 = arith.constant 0 : i32
    %c0_i32_1 = arith.constant 0 : i32
    return %arg0, %c0_i32, %c0_i32_0 : i32, i32, i32
  }
  func.func @transform_1(%arg0: i32) -> (i32, i32) {
    %c0_i32 = arith.constant 0 : i32
    %c0_i32_0 = arith.constant 0 : i32
    %c0_i32_1 = arith.constant 0 : i32
    return %c0_i32, %c0_i32_0 : i32, i32
  }
  func.func @transform_2(%arg0: i32) -> (i32, i32) {
    %c0_i32 = arith.constant 0 : i32
    %c0_i32_0 = arith.constant 0 : i32
    return %arg0, %c0_i32 : i32, i32
  }
}

</mosaic_0001>

<bundles_post_ra>
// kernel: precompute.2
= control target key start
LH: loop header
LB: loop body
LE: loop exit
PB: predicated region body
PF: predicated region fallthrough
CT: control target
= control target key end

     0   :  { %10 = vsyncpa [#allocation3], 0  ;;  %s1992_s0 = inlined_call_operand.vmem [shape: f32[256,128], index: 0, kind: input, shape index: {}]   ;;  %s1993_s1 = inlined_call_operand.hbm [shape: f32[128,384], index: 1, kind: input, shape index: {}]   ;;  %s1994_s2 = inlined_call_operand.hbm [shape: bf16[256,128], index: 2, kind: output, shape index: {0}]   ;;  %s1995_s3 = inlined_call_operand.hbm [shape: bf16[256,128], index: 3, kind: output, shape index: {1}]   ;;  %s1996_s4 = inlined_call_operand.hbm [shape: bf16[256,128], index: 4, kind: output, shape index: {2}]  }
   0x1   :  { %11 = vsyncpa [#allocation4], 0 }
   0x2   :  { %13 = vsyncpa [#allocation4 + $0x1], 0 }
   0x3   :  { %14 = vsyncpa [#allocation7], 0 }
   0x4   :  { %16 = vsyncpa [#allocation7 + $0x1], 0  ;;  %s1704_s15 = smov 0   ;;  %s1706_s16 = smov 0  }
   0x5   :  { %s1708_s17 = smov 0   ;;  %s1710_s18 = smov 0  }
   0x6 LB: > { %s1725_s19 = sadd.s32 4294967295, %s1668_s18   ;;  %s2000_s20 = sadd.s32 4294967294, %s1668_s18   ;;  %s1668_s18 = sphi %s1710_s18, %s2015_s18   ;;  %s1664_s17 = sphi %s1708_s17, %s2014_s17   ;;  %s1660_s16 = sphi %s1706_s16, %s2013_s16   ;;  %s1656_s15 = sphi %s1704_s15, %s2012_s15  }
   0x7   : > { %s1729_s21 = sadd.s32 1, %s1668_s18   ;;  %s76_s22 = sadd.s32 1, %s1664_s17 }
   0x8   : > { %s73_s23 = ssub.s32 %s1668_s18, %s1729_s21  ;;  %p86_p0 = scmp.ne.s32.totalorder %s1664_s17, %s1660_s16 }
   0x9   : > { %p74_p1 = scmp.eq.s32.totalorder %s73_s23, 0  ;;  %p87_p2 = scmp.eq.s32.totalorder %s1725_s19, 1 }
   0xa   : > { %p92_p3 = scmp.ne.s32.totalorder %s1660_s16, %s1656_s15  ;;  %p93_p4 = scmp.eq.s32.totalorder %s2000_s20, 1 }
   0xb   : > { %s1742_s24 = scalar_select %p74_p1, %s1664_s17, %s76_s22  }
   0xc   : > { %p1744_p5 = por %p87_p2, %p86_p0  ;;  %p1748_p6 = por %p93_p4, %p92_p3 }
   0xd   : > { %p1036_p7 = scmp.ge.s32.totalorder %s1668_s18, 1  ;;  %p152_p8 = scmp.lt.s32.totalorder %s1668_s18, 3 }
   0xe   : > { %s2001_s25 = scalar_select %p1744_p5, 1, 0 }
   0xf   : > { %s2002_s26 = scalar_select %p1748_p6, 1, 0 }
  0x10   : > { %p1997_p9 = scmp.eq.s32.totalorder %s1725_s19, 0  ;;  %p1755_p10 = pnand %p1036_p7, %p152_p8 }
  0x11   : > { %s1670_s28 = smov [#allocation2]   ;;  %s1514_s7 = scalar_lea.hbm %s1993_s1, 6144 }
  0x12   : > { %s2003_s27 = scalar_select %p1755_p10, 1, 0 }
  0x13   : > { %s164_s29 = sshll.u32 %s1670_s28, 4  ;;  %p1459_p11 = pneg %p1755_p10  ;;  %s165_s29 = int_to_ptr.vmem [resolvable:$true] %s164_s29 }
  0x14   : > { %p1515_p13 = scmp.ne.s32.totalorder %s1993_s1, %s1514_s7  ;;  %p1521_p3 = scmp.lt.u32.totalorder %s1514_s7, %s1993_s1 }
  0x15   : > { %p1763_p12 = pnand %p1997_p9, %p1459_p11 }
  0x17   : > { %p1516_p0 = pneg %p1763_p12 }
  0x19   : > { %p1517_p1 = pnand %p1516_p0, %p1515_p13 }
  0x1b   : > { %p1518_p2 = pneg %p1517_p1 }
  0x1d   : > { %p1523_p4 = pnand %p1521_p3, %p1518_p2 }
  0x1f   : > { %1526 = shalt.err (!%p1523_p4)
}
  0x20   : > { %s1527_s12 = scalar_lea.vmem %s165_s29, 6144  ;;  %p1535_p9 = scmp.lt.s32.totalorder %s165_s29, %s165_s29 }
  0x21   : > { %p1528_p7 = scmp.ne.s32.totalorder %s165_s29, %s1527_s12  ;;  %p1536_p6 = scmp.lt.s32.totalorder %s1527_s12, %s1527_s12 }
  0x23   : > { %p1530_p8 = pnand %p1528_p7, %p1516_p0  ;;  %p1537_p5 = por %p1536_p6, %p1535_p9 }
  0x25   : > { %p1531_p11 = pneg %p1530_p8 }
  0x27   : > { %p1538_p10 = pnand %p1537_p5, %p1531_p11 }
  0x29   : > { %1541 = shalt.err (!%p1538_p10)
}
  0x2a   : > { %s1671_s13 = smov 384   ;;  %s1672_s14 = smov 24  }
  0x2b   : > { %1462 = dma.hbm_to_vmem [thread:$0]  (!%p1763_p12), %s1993_s1, 6144, %s165_s29, [#allocation3], %s1671_s13, %s1671_s13, %s1672_s14  }
  0x2c   : > { %p2005_p13 = scmp.ne.s32.totalorder %s2003_s27, 0 }
  0x2d   : > { %p2006_p1 = scmp.eq.s32.totalorder (!%p2005_p13), %s1725_s19, 0 }
  0x2e   : > { %189 = sbr.rel (%p2005_p13) target bundleno = 425 (0x1a9), region = 28 }
  0x35   : > { %1643 = dma.done.wait (%p2006_p1), [#allocation3], 6144   ;;  %p2007_p0 = pmov %p2006_p1 }
  0x36   : > { %s1044_s28 = sshll.u32 %s1725_s19, 4  ;;  %v1673_v0 = vmov 0.0   ;;  %v251_v1 = vld [vmem:[#allocation2 + $0x8] sm:$0xff]  ;;  %v254_v2 = vld [vmem:[#allocation2 + $0x20] sm:$0xff]  ;;  %v253_v5 = vld [vmem:[#allocation2 + $0x18] sm:$0xff]  ;;  %s208_s6 = sand.u32 1, %s1660_s16  }
  0x37   : > { %1645 = vsyncadd (%p2007_p0), [#allocation3], 4294961152  ;;  %362 = vmatprep.mubr.f32.mxu0 %v1673_v0  ;;  %p226_p5 = scmp.lt.s32.totalorder %s1044_s28, 31  ;;  %v250_v3 = vld [vmem:[#allocation2] sm:$0xff]  ;;  %v1385_v4 = vpack.c.bf16 %v254_v2, %v251_v1  ;;  %v257_v6 = vld [vmem:[#allocation2 + $0x38] sm:$0xff]  ;;  %s1041_s7 = sshll.u32 %s208_s6, 6 }
  0x38   : > { %v260_v7 = vld [vmem:[#allocation2 + $0x50] sm:$0xff]  ;;  %v1387_v8 = vpack.c.bf16 %v253_v5, %v250_v3  ;;  %v259_v11 = vld [vmem:[#allocation2 + $0x48] sm:$0xff]  ;;  %v266_v13 = vld [vmem:[#allocation2 + $0x80] sm:$0xff]  ;;  %s1834_s8 = scalar_lea.vmem [#allocation5], %s1041_s7  ;;  %s1837_s9 = scalar_lea.vmem [#allocation6], %s1041_s7 }
  0x39   : > { %s2017_s28 = smov (!%p226_p5, %s1044_s28), 31  ;;  %v1389_v9 = vpack.c.bf16 %v260_v7, %v257_v6  ;;  %v256_v10 = vld [vmem:[#allocation2 + $0x30] sm:$0xff]  ;;  %v263_v12 = vld [vmem:[#allocation2 + $0x68] sm:$0xff]  ;;  %1386 = vmatprep.subr.bf16.mxu0 %v1385_v4  ;;  %v262_v16 = vld [vmem:[#allocation2 + $0x60] sm:$0xff]  ;;  %s1841_s10 = scalar_lea.vmem [#allocation8], %s1041_s7 }
  0x3a   : > { %1388 = vmatpush1.bf16.msra.mxu0 %v1387_v8  ;;  %v1391_v14 = vpack.c.bf16 %v259_v11, %v256_v10  ;;  %s1045_s27 = sshll.u32 %s2017_s28, 3  ;;  %v1393_v15 = vpack.c.bf16 %v266_v13, %v263_v12  ;;  %v265_v17 = vld [vmem:[#allocation2 + $0x78] sm:$0xff]  ;;  %v272_v19 = vld [vmem:[#allocation2 + $0xb0] sm:$0xff]  ;;  %v271_v23 = vld [vmem:[#allocation2 + $0xa8] sm:$0xff]  ;;  %s868_s11 = sshll.u32 %s1834_s8, 4  ;;  %s1864_s11 = int_to_ptr.vmem [resolvable:$true] %s868_s11 }
  0x3b   : > { %1390 = vmatprep.subr.bf16.mxu0 %v1389_v9  ;;  %v269_v18 = vld [vmem:[#allocation2 + $0x98] sm:$0xff]  ;;  %s1794_s5 = scalar_lea.vmem %s1992_s0, %s1045_s27  ;;  %v1395_v20 = vpack.c.bf16 %v265_v17, %v262_v16  ;;  %v268_v22 = vld [vmem:[#allocation2 + $0x90] sm:$0xff]  ;;  %v275_v24 = vld [vmem:[#allocation2 + $0xc8] sm:$0xff]  ;;  %s884_s12 = sshll.u32 %s1837_s9, 4  ;;  %s1867_s12 = int_to_ptr.vmem [resolvable:$true] %s884_s12 }
  0x3c   : > { %v1397_v21 = vpack.c.bf16 %v272_v19, %v269_v18  ;;  %v278_v25 = vld [vmem:[#allocation2 + $0xe0] sm:$0xff]  ;;  %v252_v27 = vld [vmem:[#allocation2 + $0x10] sm:$0xff]  ;;  %v255_v28 = vld [vmem:[#allocation2 + $0x28] sm:$0xff]  ;;  %v1399_v29 = vpack.c.bf16 %v271_v23, %v268_v22  ;;  %s1153_s13 = sshll.u32 %s1725_s19, 10  ;;  %s900_s22 = sshll.u32 %s1841_s10, 4  ;;  %s1881_s22 = int_to_ptr.vmem [resolvable:$true] %s900_s22 }
  0x3d   : > { %v1797_v26 = vld [vmem:[%s1794_s5] sm:$0xff]  ;;  %v1417_v31 = vpack.c.bf16 %v255_v28, %v252_v27  ;;  %v261_v33 = vld [vmem:[#allocation2 + $0x58] sm:$0xff]  ;;  %v1401_v34 = vpack.c.bf16 %v278_v25, %v275_v24  ;;  %v264_v37 = vld [vmem:[#allocation2 + $0x70] sm:$0xff]  ;;  %s1874_s27 = scalar_lea.hbm %s1994_s2, %s1153_s13  ;;  %s1887_s20 = scalar_lea.hbm %s1996_s4, %s1153_s13 }
  0x3e   : > { %1392 = vmatpush1.bf16.msra.mxu0 %v1391_v14  ;;  %1361 = vmatprep.mubr.f32.mxu1 %v1797_v26  ;;  %v274_v30 = vld [vmem:[#allocation2 + $0xc0] sm:$0xff]  ;;  %v277_v35 = vld [vmem:[#allocation2 + $0xd8] sm:$0xff]  ;;  %v267_v38 = vld [vmem:[#allocation2 + $0x88] sm:$0xff]  ;;  %s1892_s23 = scalar_lea.sflag [#allocation4], %s208_s6  ;;  %s1542_s28 = scalar_lea.vmem %s1864_s11, 1024 }
  0x3f   : > { %1394 = vmatprep.subr.bf16.mxu0 %v1393_v15  ;;  %v258_v32 = vld [vmem:[#allocation2 + $0x40] sm:$0xff]  ;;  %v281_v39 = vld [vmem:[#allocation2 + $0xf8] sm:$0xff]  ;;  %v284_v40 = vld [vmem:[#allocation2 + $0x110] sm:$0xff]  ;;  %1418 = vmatprep.subr.bf16.mxu1 %v1417_v31  ;;  %v1403_v41 = vpack.c.bf16 %v277_v35, %v274_v30  ;;  %v1425_v43 = vpack.c.bf16 %v267_v38, %v264_v37  ;;  %p1543_p6 = scmp.ne.s32.totalorder %s1864_s11, %s1542_s28  ;;  %p2008_p9 = scmp.ne.s32.totalorder %s2001_s25, 0 }
  0x40   : > { %v1421_v36 = vpack.c.bf16 %v261_v33, %v258_v32  ;;  %1420 = vmatpush3.bf16.msra.mxu1 %v1417_v31  ;;  %v280_v42 = vld [vmem:[#allocation2 + $0xf0] sm:$0xff]  ;;  %v1405_v44 = vpack.c.bf16 %v284_v40, %v281_v39  ;;  %v283_v45 = vld [vmem:[#allocation2 + $0x108] sm:$0xff]  ;;  %v270_v46 = vld [vmem:[#allocation2 + $0xa0] sm:$0xff]  ;;  %s1674_s29 = smov [#allocation5]  }
  0x41   : > { %v273_v47 = vld [vmem:[#allocation2 + $0xb8] sm:$0xff]  ;;  %v287_v48 = vld [vmem:[#allocation2 + $0x128] sm:$0xff]  ;;  %v290_v49 = vld [vmem:[#allocation2 + $0x140] sm:$0xff]  ;;  %v1407_v50 = vpack.c.bf16 %v283_v45, %v280_v42  ;;  %p1544_p10 = pnand %p1543_p6, %p2008_p9  ;;  %s1546_s30 = sshll.u32 %s1674_s29, 4  ;;  %s1547_s30 = int_to_ptr.vmem [resolvable:$false] %s1546_s30 }
  0x42   : > { %1396 = vmatpush1.bf16.msra.mxu0 %v1395_v20  ;;  %1422 = vmatprep.subr.bf16.mxu1 %v1421_v36  ;;  %v286_v51 = vld [vmem:[#allocation2 + $0x120] sm:$0xff]  ;;  %v1429_v52 = vpack.c.bf16 %v273_v47, %v270_v46  ;;  %v1409_v53 = vpack.c.bf16 %v290_v49, %v287_v48  ;;  %v289_v54 = vld [vmem:[#allocation2 + $0x138] sm:$0xff]  ;;  %v276_v55 = vld [vmem:[#allocation2 + $0xd0] sm:$0xff]  ;;  %s1548_s14 = scalar_lea.vmem %s1547_s30, 2048  ;;  %p1549_p2 = scmp.lt.s32.totalorder %s1864_s11, %s1547_s30 }
  0x43   : > { %1398 = vmatprep.subr.bf16.mxu0 %v1397_v21  ;;  %v279_v56 = vld [vmem:[#allocation2 + $0xe8] sm:$0xff]  ;;  %v293_v57 = vld [vmem:[#allocation2 + $0x158] sm:$0xff]  ;;  %v296_v58 = vld [vmem:[#allocation2 + $0x170] sm:$0xff]  ;;  %v1411_v59 = vpack.c.bf16 %v289_v54, %v286_v51  ;;  %p1545_p12 = pneg %p1544_p10  ;;  %p1550_p3 = scmp.lt.s32.totalorder %s1548_s14, %s1542_s28 }
  0x44   : > { %1424 = vmatpush3.bf16.msra.mxu1 %v1421_v36  ;;  %v292_v60 = vld [vmem:[#allocation2 + $0x150] sm:$0xff]  ;;  %v1433_v61 = vpack.c.bf16 %v279_v56, %v276_v55  ;;  %v1413_v62 = vpack.c.bf16 %v296_v58, %v293_v57  ;;  %v295_v63 = vld [vmem:[#allocation2 + $0x168] sm:$0xff]  ;;  %v282_v1 = vld [vmem:[#allocation2 + $0x100] sm:$0xff] }
  0x45   : > { %1426 = vmatprep.subr.bf16.mxu1 %v1425_v43  ;;  %v285_v2 = vld [vmem:[#allocation2 + $0x118] sm:$0xff]  ;;  %v1415_v3 = vpack.c.bf16 %v295_v63, %v292_v60  ;;  %v288_v5 = vld [vmem:[#allocation2 + $0x130] sm:$0xff]  ;;  %v291_v6 = vld [vmem:[#allocation2 + $0x148] sm:$0xff]  ;;  %p1551_p4 = por %p1550_p3, %p1549_p2 }
  0x46   : > { %1400 = vmatpush1.bf16.msra.mxu0 %v1399_v29  ;;  %v1437_v4 = vpack.c.bf16 %v285_v2, %v282_v1  ;;  %v1441_v7 = vpack.c.bf16 %v291_v6, %v288_v5  ;;  %v294_v8 = vld [vmem:[#allocation2 + $0x160] sm:$0xff]  ;;  %v297_v9 = vld [vmem:[#allocation2 + $0x178] sm:$0xff]  ;;  %v235_v10 = vld [vmem:[%s1794_s5 + $0x8] sm:$0xff] }
  0x47   : > { %1402 = vmatprep.subr.bf16.mxu0 %v1401_v34  ;;  %v1445_v11 = vpack.c.bf16 %v297_v9, %v294_v8  ;;  %v236_v12 = vld [vmem:[%s1794_s5 + $0x10] sm:$0xff]  ;;  %v237_v13 = vld [vmem:[%s1794_s5 + $0x18] sm:$0xff]  ;;  %v238_v14 = vld [vmem:[%s1794_s5 + $0x20] sm:$0xff]  ;;  %p1552_p7 = pnand %p1551_p4, %p1545_p12 }
  0x48   : > { %1428 = vmatpush3.bf16.msra.mxu1 %v1425_v43  ;;  %v239_v15 = vld [vmem:[%s1794_s5 + $0x28] sm:$0xff]  ;;  %v240_v16 = vld [vmem:[%s1794_s5 + $0x30] sm:$0xff]  ;;  %v241_v17 = vld [vmem:[%s1794_s5 + $0x38] sm:$0xff] }
  0x49   : > { %1430 = vmatprep.subr.bf16.mxu1 %v1429_v52  ;;  %v242_v18 = vld [vmem:[%s1794_s5 + $0x40] sm:$0xff]  ;;  %v243_v19 = vld [vmem:[%s1794_s5 + $0x48] sm:$0xff]  ;;  %v244_v20 = vld [vmem:[%s1794_s5 + $0x50] sm:$0xff] }
  0x4a   : > { %1404 = vmatpush1.bf16.msra.mxu0 %v1403_v41  ;;  %v245_v21 = vld [vmem:[%s1794_s5 + $0x58] sm:$0xff]  ;;  %v246_v22 = vld [vmem:[%s1794_s5 + $0x60] sm:$0xff]  ;;  %v247_v23 = vld [vmem:[%s1794_s5 + $0x68] sm:$0xff] }
  0x4b   : > { %1406 = vmatprep.subr.bf16.mxu0 %v1405_v44  ;;  %v248_v24 = vld [vmem:[%s1794_s5 + $0x70] sm:$0xff]  ;;  %v249_v25 = vld [vmem:[%s1794_s5 + $0x78] sm:$0xff]  ;;  %s1879_s5 = scalar_lea.hbm %s1995_s3, %s1153_s13 }
  0x4c   : > { %1432 = vmatpush3.bf16.msra.mxu1 %v1429_v52 }
  0x4d   : > { %1434 = vmatprep.subr.bf16.mxu1 %v1433_v61 }
  0x4e   : > { %1408 = vmatpush1.bf16.msra.mxu0 %v1407_v50 }
  0x4f   : > { %1410 = vmatprep.subr.bf16.mxu0 %v1409_v53 }
  0x50   : > { %1436 = vmatpush3.bf16.msra.mxu1 %v1433_v61 }
  0x51   : > { %1438 = vmatprep.subr.bf16.mxu1 %v1437_v4 }
  0x52   : > { %1412 = vmatpush1.bf16.msra.mxu0 %v1411_v59 }
  0x53   : > { %1414 = vmatprep.subr.bf16.mxu0 %v1413_v62 }
  0x54   : > { %1440 = vmatpush3.bf16.msra.mxu1 %v1437_v4 }
  0x55   : > { %1442 = vmatprep.subr.bf16.mxu1 %v1441_v7 }
  0x56   : > { %1416 = vmatpush1.bf16.msra.mxu0 %v1415_v3 }
  0x58   : > { %1444 = vmatpush3.bf16.msra.mxu1 %v1441_v7 }
  0x59   : > { %363 = vmatmul.mubr.f32.vlgmr.msra.gmra.mrb[0].mxu0 %v1797_v26  ;;  %1446 = vmatprep.subr.bf16.mxu1 %v1445_v11 }
  0x5a   : > { %368 = vmatprep.mubr.f32.mxu0 %v1673_v0 }
  0x5c   : > { %1448 = vmatpush3.bf16.msra.mxu1 %v1445_v11 }
  0x5d   : > { %369 = vmatmul.mubr.f32.gmra.mrb[2].mxu0 %v235_v10 }
  0x5e   : > { %374 = vmatprep.mubr.f32.mxu0 %v1673_v0 }
  0x5f   : > { %1362 = vmatmul.mubr.f32.vlgmr.msra.gmra.mrb[0].mxu1 %v235_v10 }
  0x60   : > { %1364 = vmatprep.mubr.f32.mxu1 %v236_v12 }
  0x61   : > { %375 = vmatmul.mubr.f32.gmra.mrb[4].mxu0 %v236_v12 }
  0x62   : > { %380 = vmatprep.mubr.f32.mxu0 %v1673_v0 }
  0x63   : > { %1365 = vmatmul.mubr.f32.gmra.mrb[2].mxu1 %v237_v13 }
  0x64   : > { %1367 = vmatprep.mubr.f32.mxu1 %v238_v14 }
  0x65   : > { %381 = vmatmul.mubr.f32.gmra.mrb[6].mxu0 %v237_v13 }
  0x66   : > { %386 = vmatprep.mubr.f32.mxu0 %v1673_v0 }
  0x67   : > { %1368 = vmatmul.mubr.f32.gmra.mrb[4].mxu1 %v239_v15 }
  0x68   : > { %1370 = vmatprep.mubr.f32.mxu1 %v240_v16 }
  0x69   : > { %387 = vmatmul.mubr.f32.gmra.mrb[8].mxu0 %v238_v14 }
  0x6a   : > { %392 = vmatprep.mubr.f32.mxu0 %v1673_v0 }
  0x6b   : > { %1371 = vmatmul.mubr.f32.gmra.mrb[6].mxu1 %v241_v17 }
  0x6c   : > { %1373 = vmatprep.mubr.f32.mxu1 %v242_v18 }
  0x6d   : > { %393 = vmatmul.mubr.f32.gmra.mrb[10].mxu0 %v239_v15 }
  0x6e   : > { %398 = vmatprep.mubr.f32.mxu0 %v1673_v0 }
  0x6f   : > { %1374 = vmatmul.mubr.f32.gmra.mrb[8].mxu1 %v243_v19 }
  0x70   : > { %1376 = vmatprep.mubr.f32.mxu1 %v244_v20 }
  0x71   : > { %399 = vmatmul.mubr.f32.gmra.mrb[12].mxu0 %v240_v16 }
  0x72   : > { %404 = vmatprep.mubr.f32.mxu0 %v1673_v0 }
  0x73   : > { %1377 = vmatmul.mubr.f32.gmra.mrb[10].mxu1 %v245_v21 }
  0x74   : > { %1379 = vmatprep.mubr.f32.mxu1 %v246_v22 }
  0x75   : > { %405 = vmatmul.mubr.f32.gmra.mrb[14].mxu0 %v241_v17 }
  0x76   : > { %410 = vmatprep.mubr.f32.mxu0 %v1673_v0 }
  0x77   : > { %1380 = vmatmul.mubr.f32.gmra.mrb[12].mxu1 %v247_v23 }
  0x78   : > { %1382 = vmatprep.mubr.f32.mxu1 %v248_v24 }
  0x79   : > { %411 = vmatmul.mubr.f32.gmra.mrb[16].mxu0 %v242_v18 }
  0x7a   : > { %416 = vmatprep.mubr.f32.mxu0 %v1673_v0 }
  0x7b   : > { %1383 = vmatmul.mubr.f32.gmra.mrb[14].mxu1 %v249_v25 }
  0x7d   : > { %417 = vmatmul.mubr.f32.gmra.mrb[18].mxu0 %v243_v19 }
  0x7e   : > { %422 = vmatprep.mubr.f32.mxu0 %v1673_v0 }
  0x81   : > { %423 = vmatmul.mubr.f32.gmra.mrb[20].mxu0 %v244_v20 }
  0x82   : > { %428 = vmatprep.mubr.f32.mxu0 %v1673_v0 }
  0x85   : > { %429 = vmatmul.mubr.f32.gmra.mrb[22].mxu0 %v245_v21 }
  0x86   : > { %434 = vmatprep.mubr.f32.mxu0 %v1673_v0 }
  0x89   : > { %435 = vmatmul.mubr.f32.gmra.mrb[24].mxu0 %v246_v22 }
  0x8a   : > { %440 = vmatprep.mubr.f32.mxu0 %v1673_v0 }
  0x8d   : > { %441 = vmatmul.mubr.f32.gmra.mrb[26].mxu0 %v247_v23 }
  0x8e   : > { %446 = vmatprep.mubr.f32.mxu0 %v1673_v0 }
  0x91   : > { %447 = vmatmul.mubr.f32.gmra.mrb[28].mxu0 %v248_v24 }
  0x92   : > { %452 = vmatprep.mubr.f32.mxu0 %v1673_v0 }
  0x95   : > { %453 = vmatmul.mubr.f32.gmra.mrb[30].mxu0 %v249_v25 }
 0x12c   : > { %v364_v26 = vpop.f32.mrb[0].mxu0 }
 0x12d   : > { %v366_v27 = vpop.f32.mrb[1].mxu0 }
 0x130   : > { %v370_v28 = vpop.f32.mrb[2].mxu0 }
 0x131   : > { %v1159_v29 = vpack.c.bf16 %v370_v28, %v364_v26  ;;  %v372_v30 = vpop.f32.mrb[3].mxu0 }
 0x132   : > { %v1199_v31 = vpack.c.bf16 %v372_v30, %v366_v27  ;;  %v1363_v33 = vpop.f32.mrb[0].mxu1 }
 0x133   : > { %1160 = vst [vmem:[%s1834_s8] sm:$0xff] %v1159_v29   ;;  %v525_v35 = vpop.f32.mrb[1].mxu1 }
 0x134   : > { %1200 = vst [vmem:[%s1837_s9] sm:$0xff] %v1199_v31   ;;  %v376_v0 = vpop.f32.mrb[4].mxu0  ;;  %v1239_v38 = vpack.c.bf16 %v1363_v33, %v525_v35 }
 0x135   : > { %v378_v32 = vpop.f32.mrb[5].mxu0 }
 0x136   : > { %1240 = vst [vmem:[%s1841_s10] sm:$0xff] %v1239_v38   ;;  %v1366_v40 = vpop.f32.mrb[2].mxu1 }
 0x137   : > { %v535_v42 = vpop.f32.mrb[3].mxu1 }
 0x138   : > { %v382_v34 = vpop.f32.mrb[6].mxu0  ;;  %v1244_v44 = vpack.c.bf16 %v1366_v40, %v535_v42 }
 0x139   : > { %v1164_v36 = vpack.c.bf16 %v382_v34, %v376_v0  ;;  %v384_v37 = vpop.f32.mrb[7].mxu0 }
 0x13a   : > { %v1204_v39 = vpack.c.bf16 %v384_v37, %v378_v32  ;;  %1290 = vst [vmem:[%s1841_s10 + $0x8] sm:$0xff] %v1244_v44   ;;  %v1369_v45 = vpop.f32.mrb[4].mxu1 }
 0x13b   : > { %1276 = vst [vmem:[%s1834_s8 + $0x8] sm:$0xff] %v1164_v36   ;;  %v545_v47 = vpop.f32.mrb[5].mxu1 }
 0x13c   : > { %1283 = vst [vmem:[%s1837_s9 + $0x8] sm:$0xff] %v1204_v39   ;;  %v388_v41 = vpop.f32.mrb[8].mxu0  ;;  %v1249_v50 = vpack.c.bf16 %v1369_v45, %v545_v47 }
 0x13d   : > { %v390_v43 = vpop.f32.mrb[9].mxu0 }
 0x13e   : > { %1291 = vst [vmem:[%s1841_s10 + $0x10] sm:$0xff] %v1249_v50   ;;  %v1372_v52 = vpop.f32.mrb[6].mxu1 }
 0x13f   : > { %v555_v54 = vpop.f32.mrb[7].mxu1 }
 0x140   : > { %v394_v46 = vpop.f32.mrb[10].mxu0  ;;  %v1254_v56 = vpack.c.bf16 %v1372_v52, %v555_v54 }
 0x141   : > { %v1169_v48 = vpack.c.bf16 %v394_v46, %v388_v41  ;;  %v396_v49 = vpop.f32.mrb[11].mxu0 }
 0x142   : > { %v1209_v51 = vpack.c.bf16 %v396_v49, %v390_v43  ;;  %1292 = vst [vmem:[%s1841_s10 + $0x18] sm:$0xff] %v1254_v56   ;;  %v1375_v57 = vpop.f32.mrb[8].mxu1 }
 0x143   : > { %1277 = vst [vmem:[%s1834_s8 + $0x10] sm:$0xff] %v1169_v48   ;;  %v565_v59 = vpop.f32.mrb[9].mxu1 }
 0x144   : > { %1284 = vst [vmem:[%s1837_s9 + $0x10] sm:$0xff] %v1209_v51   ;;  %v400_v53 = vpop.f32.mrb[12].mxu0  ;;  %v1259_v62 = vpack.c.bf16 %v1375_v57, %v565_v59 }
 0x145   : > { %v402_v55 = vpop.f32.mrb[13].mxu0 }
 0x146   : > { %1293 = vst [vmem:[%s1841_s10 + $0x20] sm:$0xff] %v1259_v62   ;;  %v1378_v1 = vpop.f32.mrb[10].mxu1 }
 0x147   : > { %v575_v3 = vpop.f32.mrb[11].mxu1 }
 0x148   : > { %v406_v58 = vpop.f32.mrb[14].mxu0  ;;  %v1264_v5 = vpack.c.bf16 %v1378_v1, %v575_v3 }
 0x149   : > { %v1174_v60 = vpack.c.bf16 %v406_v58, %v400_v53  ;;  %v408_v61 = vpop.f32.mrb[15].mxu0 }
 0x14a   : > { %v1214_v63 = vpack.c.bf16 %v408_v61, %v402_v55  ;;  %1294 = vst [vmem:[%s1841_s10 + $0x28] sm:$0xff] %v1264_v5   ;;  %v1381_v6 = vpop.f32.mrb[12].mxu1 }
 0x14b   : > { %1278 = vst [vmem:[%s1834_s8 + $0x18] sm:$0xff] %v1174_v60   ;;  %v585_v8 = vpop.f32.mrb[13].mxu1 }
 0x14c   : > { %1285 = vst [vmem:[%s1837_s9 + $0x18] sm:$0xff] %v1214_v63   ;;  %v412_v2 = vpop.f32.mrb[16].mxu0  ;;  %v1269_v11 = vpack.c.bf16 %v1381_v6, %v585_v8 }
 0x14d   : > { %v414_v4 = vpop.f32.mrb[17].mxu0 }
 0x14e   : > { %1295 = vst [vmem:[%s1841_s10 + $0x30] sm:$0xff] %v1269_v11   ;;  %v1384_v13 = vpop.f32.mrb[14].mxu1 }
 0x14f   : > { %v595_v15 = vpop.f32.mrb[15].mxu1 }
 0x150   : > { %v418_v7 = vpop.f32.mrb[18].mxu0  ;;  %v1274_v17 = vpack.c.bf16 %v1384_v13, %v595_v15 }
 0x151   : > { %v1179_v9 = vpack.c.bf16 %v418_v7, %v412_v2  ;;  %v420_v10 = vpop.f32.mrb[19].mxu0 }
 0x152   : > { %v1219_v12 = vpack.c.bf16 %v420_v10, %v414_v4  ;;  %1296 = vst [vmem:[%s1841_s10 + $0x38] sm:$0xff] %v1274_v17  }
 0x153   : > { %1279 = vst [vmem:[%s1834_s8 + $0x20] sm:$0xff] %v1179_v9  }
 0x154   : > { %1286 = vst [vmem:[%s1837_s9 + $0x20] sm:$0xff] %v1219_v12   ;;  %v424_v14 = vpop.f32.mrb[20].mxu0 }
 0x155   : > { %v426_v16 = vpop.f32.mrb[21].mxu0 }
 0x158   : > { %v430_v18 = vpop.f32.mrb[22].mxu0 }
 0x159   : > { %v1184_v19 = vpack.c.bf16 %v430_v18, %v424_v14  ;;  %v432_v20 = vpop.f32.mrb[23].mxu0 }
 0x15a   : > { %v1224_v21 = vpack.c.bf16 %v432_v20, %v426_v16 }
 0x15b   : > { %1280 = vst [vmem:[%s1834_s8 + $0x28] sm:$0xff] %v1184_v19  }
 0x15c   : > { %1287 = vst [vmem:[%s1837_s9 + $0x28] sm:$0xff] %v1224_v21   ;;  %v436_v22 = vpop.f32.mrb[24].mxu0 }
 0x15d   : > { %v438_v23 = vpop.f32.mrb[25].mxu0 }
 0x160   : > { %v442_v24 = vpop.f32.mrb[26].mxu0 }
 0x161   : > { %v1189_v25 = vpack.c.bf16 %v442_v24, %v436_v22  ;;  %v444_v26 = vpop.f32.mrb[27].mxu0 }
 0x162   : > { %v1229_v27 = vpack.c.bf16 %v444_v26, %v438_v23 }
 0x163   : > { %1281 = vst [vmem:[%s1834_s8 + $0x30] sm:$0xff] %v1189_v25  }
 0x164   : > { %1288 = vst [vmem:[%s1837_s9 + $0x30] sm:$0xff] %v1229_v27   ;;  %v448_v28 = vpop.f32.mrb[28].mxu0 }
 0x165   : > { %v450_v29 = vpop.f32.mrb[29].mxu0 }
 0x168   : > { %v454_v30 = vpop.f32.mrb[30].mxu0 }
 0x169   : > { %v1194_v31 = vpack.c.bf16 %v454_v30, %v448_v28  ;;  %v456_v0 = vpop.f32.mrb[31].mxu0 }
 0x16a   : > { %v1234_v32 = vpack.c.bf16 %v456_v0, %v450_v29 }
 0x16b   : > { %1282 = vst [vmem:[%s1834_s8 + $0x38] sm:$0xff] %v1194_v31  }
 0x16c   : > { %1289 = vst [vmem:[%s1837_s9 + $0x38] sm:$0xff] %v1234_v32  }
 0x16d   : > { %1555 = shalt.err (!%p1552_p7)
}
 0x16e   : > { %s1556_s6 = scalar_lea.hbm %s1874_s27, 1024  ;;  %s1560_s13 = scalar_lea.hbm %s1994_s2, 2048 }
 0x16f   : > { %p1557_p8 = scmp.ne.s32.totalorder %s1874_s27, %s1556_s6  ;;  %p1561_p1 = scmp.lt.u32.totalorder %s1874_s27, %s1994_s2 }
 0x170   : > { %p1562_p0 = scmp.lt.u32.totalorder %s1560_s13, %s1556_s6  ;;  %p1564_p6 = scmp.lt.u32.totalorder %s1556_s6, %s1874_s27 }
 0x171   : > { %p1558_p11 = pnand %p1557_p8, %p2008_p9 }
 0x172   : > { %p1563_p5 = por %p1562_p0, %p1561_p1 }
 0x173   : > { %p1559_p13 = pneg %p1558_p11 }
 0x174   : > { %p1565_p10 = por %p1564_p6, %p1563_p5 }
 0x176   : > { %p1566_p12 = pnand %p1565_p10, %p1559_p13 }
 0x178   : > { %1569 = shalt.err (!%p1566_p12)
}
 0x179   : > { %s1675_s14 = smov 64   ;;  %s1676_s28 = smov 4  }
 0x17a   : > { %1453 = dma.vmem_to_hbm [thread:$0]  (%p2008_p9), %s1864_s11, 1024, %s1874_s27, %s1892_s23, %s1675_s14, %s1675_s14, %s1676_s28  }
 0x17b   : > { %s2009_s29 = sand.u32 1, %s1725_s19   ;;  %s1570_s6 = scalar_lea.vmem %s1867_s12, 1024 }
 0x17c   : > { %s1921_s30 = scalar_lea.sflag [#allocation7], %s2009_s29  ;;  %p1571_p2 = scmp.ne.s32.totalorder %s1867_s12, %s1570_s6 }
 0x17d   : > { %s1677_s8 = smov [#allocation6]  }
 0x17e   : > { %p1572_p3 = pnand %p1571_p2, %p2008_p9  ;;  %s1574_s9 = sshll.u32 %s1677_s8, 4  ;;  %s1575_s9 = int_to_ptr.vmem [resolvable:$false] %s1574_s9 }
 0x17f   : > { %s1576_s13 = scalar_lea.vmem %s1575_s9, 2048  ;;  %p1577_p7 = scmp.lt.s32.totalorder %s1867_s12, %s1575_s9 }
 0x180   : > { %p1573_p4 = pneg %p1572_p3  ;;  %p1578_p8 = scmp.lt.s32.totalorder %s1576_s13, %s1570_s6 }
 0x182   : > { %p1579_p11 = por %p1578_p8, %p1577_p7 }
 0x184   : > { %p1580_p13 = pnand %p1579_p11, %p1573_p4 }
 0x186   : > { %1583 = shalt.err (!%p1580_p13)
}
 0x187   : > { %s1584_s19 = scalar_lea.hbm %s1879_s5, 1024  ;;  %s1588_s23 = scalar_lea.hbm %s1995_s3, 2048 }
 0x188   : > { %p1585_p1 = scmp.ne.s32.totalorder %s1879_s5, %s1584_s19  ;;  %p1589_p6 = scmp.lt.u32.totalorder %s1879_s5, %s1995_s3 }
 0x189   : > { %p1590_p10 = scmp.lt.u32.totalorder %s1588_s23, %s1584_s19  ;;  %p1592_p2 = scmp.lt.u32.totalorder %s1584_s19, %s1879_s5 }
 0x18a   : > { %p1586_p0 = pnand %p1585_p1, %p2008_p9 }
 0x18b   : > { %p1591_p12 = por %p1590_p10, %p1589_p6 }
 0x18c   : > { %p1587_p5 = pneg %p1586_p0 }
 0x18d   : > { %p1593_p3 = por %p1592_p2, %p1591_p12 }
 0x18f   : > { %p1594_p4 = pnand %p1593_p3, %p1587_p5 }
 0x191   : > { %1597 = shalt.err (!%p1594_p4)
}
 0x192   : > { %1454 = dma.vmem_to_hbm [thread:$0]  (%p2008_p9), %s1867_s12, 1024, %s1879_s5, %s1921_s30, %s1675_s14, %s1675_s14, %s1676_s28  }
 0x193   : > { %s1598_s29 = scalar_lea.vmem %s1881_s22, 1024  ;;  %s1678_s6 = smov [#allocation8]  }
 0x194   : > { %p1599_p7 = scmp.ne.s32.totalorder %s1881_s22, %s1598_s29  ;;  %s1602_s8 = sshll.u32 %s1678_s6, 4  ;;  %s1603_s8 = int_to_ptr.vmem [resolvable:$false] %s1602_s8 }
 0x195   : > { %s1604_s9 = scalar_lea.vmem %s1603_s8, 2048  ;;  %p1605_p13 = scmp.lt.s32.totalorder %s1881_s22, %s1603_s8 }
 0x196   : > { %p1600_p8 = pnand %p1599_p7, %p2008_p9  ;;  %p1606_p1 = scmp.lt.s32.totalorder %s1604_s9, %s1598_s29 }
 0x198   : > { %p1601_p11 = pneg %p1600_p8  ;;  %p1607_p0 = por %p1606_p1, %p1605_p13 }
 0x19a   : > { %p1608_p5 = pnand %p1607_p0, %p1601_p11 }
 0x19c   : > { %1611 = shalt.err (!%p1608_p5)
}
 0x19d   : > { %s1612_s12 = scalar_lea.hbm %s1887_s20, 1024  ;;  %s1616_s19 = scalar_lea.hbm %s1996_s4, 2048 }
 0x19e   : > { %p1613_p6 = scmp.ne.s32.totalorder %s1887_s20, %s1612_s12  ;;  %p1617_p2 = scmp.lt.u32.totalorder %s1887_s20, %s1996_s4 }
 0x19f   : > { %p1618_p3 = scmp.lt.u32.totalorder %s1616_s19, %s1612_s12  ;;  %p1620_p7 = scmp.lt.u32.totalorder %s1612_s12, %s1887_s20 }
 0x1a0   : > { %p1614_p10 = pnand %p1613_p6, %p2008_p9 }
 0x1a1   : > { %p1619_p4 = por %p1618_p3, %p1617_p2 }
 0x1a2   : > { %p1615_p12 = pneg %p1614_p10 }
 0x1a3   : > { %p1621_p8 = por %p1620_p7, %p1619_p4 }
 0x1a5   : > { %p1622_p11 = pnand %p1621_p8, %p1615_p12 }
 0x1a7   : > { %1625 = shalt.err (!%p1622_p11)
}
 0x1a8   : > { %1455 = dma.vmem_to_hbm [thread:$0]  (%p2008_p9), %s1881_s22, 1024, %s1887_s20, %s1921_s30, %s1675_s14, %s1675_s14, %s1676_s28  }
 0x1a9 PF: > { %p1475_p13 = scmp.ge.s32.totalorder %s1668_s18, 2  ;;  %s915_s23 = sand.u32 1, %s1656_s15  }
 0x1aa   : > { %p2010_p1 = scmp.ne.s32.totalorder %s2002_s26, 0  ;;  %s916_s7 = scalar_lea.sflag [#allocation4], %s915_s23 }
 0x1ac   : > { %p1464_p0 = pnand %p1475_p13, %p2010_p1 }
 0x1ae   : > { %1647 = dma.done.wait (!%p1464_p0), %s916_s7, 1024  }
 0x1af   : > { %1649 = vsyncadd (!%p1464_p0), %s916_s7, 4294966272  ;;  %s2011_s25 = sadd.s32 4294967294, %s1668_s18  }
 0x1b0   : > { %s924_s10 = sand.u32 1, %s2011_s25  }
 0x1b1   : > { %s925_s29 = scalar_lea.sflag [#allocation7], %s924_s10 }
 0x1b2   : > { %1651 = dma.done.wait (!%p1464_p0), %s925_s29, 2048  }
 0x1b3   : > { %1653 = vsyncadd (!%p1464_p0), %s925_s29, 4294965248  ;;  %p19_p9 = scmp.ge.s32.totalorder %s1729_s21, 4   ;;  %s2012_s15 = smov %s1660_s16 }
 0x1b4   : > { %s2013_s16 = smov %s1664_s17  ;;  %s2014_s17 = smov %s1742_s24 }
 0x1b5   : > { %s2015_s18 = smov %s1729_s21  ;;  %21 = sbr.rel (!%p19_p9) target bundleno = 6 (0x6), region = 100 }
 0x1bc   :  { %939 = vsyncpa [#allocation3], 1 }
 0x1bd   :  { %941 = vsyncpa [#allocation3 + $0x1], 1 }
 0x1be   :  { %942 = vsyncpa [#allocation4], 1 }
 0x1bf   :  { %944 = vsyncpa [#allocation4 + $0x1], 1 }
 0x1c0   :  { %945 = vsyncpa [#allocation7], 1 }
 0x1c1   :  { %947 = vsyncpa [#allocation7 + $0x1], 1 }

// kernel: precompute.3
= control target key start
LH: loop header
LB: loop body
LE: loop exit
PB: predicated region body
PF: predicated region fallthrough
CT: control target
= control target key end

     0   :  { %7 = vsyncpa [#allocation3], 0  ;;  %s1036_s0 = inlined_call_operand.hbm [shape: f32[16,16,128], index: 0, kind: input, shape index: {}]   ;;  %s1037_s1 = inlined_call_operand.hbm [shape: f32[128,128], index: 1, kind: input, shape index: {}]   ;;  %s1038_s2 = inlined_call_operand.hbm [shape: f32[16,128], index: 2, kind: output, shape index: {}]  }
   0x1   :  { %9 = vsyncpa [#allocation3 + $0x1], 0 }
   0x2   :  { %10 = vsyncpa [#allocation6], 0 }
   0x3   :  { %11 = vsyncpa [#allocation4], 0 }
   0x4   :  { %13 = vsyncpa [#allocation4 + $0x1], 0  ;;  %s785_s9 = smov 0   ;;  %s787_s10 = smov 0  }
   0x5   :  { %s789_s11 = smov 0   ;;  %s791_s12 = smov 0  }
   0x6 LB: > { %s806_s13 = sadd.s32 4294967295, %s760_s12   ;;  %s462_s14 = sadd.s32 4294967294, %s760_s12   ;;  %s760_s12 = sphi %s791_s12, %s1058_s12   ;;  %s756_s11 = sphi %s789_s11, %s1057_s11   ;;  %s752_s10 = sphi %s787_s10, %s1056_s10   ;;  %s748_s9 = sphi %s785_s9, %s1055_s9  }
   0x7   : > { %p39_p0 = scmp.ne.s32.totalorder %s752_s10, %s748_s9  ;;  %p1039_p1 = scmp.eq.s32.totalorder %s806_s13, 0 }
   0x8   : > { %p90_p3 = scmp.eq.s32.totalorder %s462_s14, 1  ;;  %p463_p5 = scmp.ge.s32.totalorder %s760_s12, 1 }
   0x9   : > { %p815_p4 = por %p1039_p1, %p39_p0  ;;  %p97_p7 = scmp.lt.s32.totalorder %s760_s12, 3 }
   0xa   : > { %p820_p6 = por %p90_p3, %p39_p0  ;;  %s762_s18 = smov [#allocation5]  }
   0xb   : > { %s1042_s15 = scalar_select %p815_p4, 1, 0 }
   0xc   : > { %s1043_s16 = scalar_select %p820_p6, 1, 0 }
   0xd   : > { %p825_p8 = pnand %p463_p5, %p97_p7  ;;  %s109_s19 = sshll.u32 %s762_s18, 4  ;;  %s829_s19 = int_to_ptr.vmem [resolvable:$true] %s109_s19 }
   0xe   : > { %s841_s21 = sadd.s32 1, %s760_s12   ;;  %s26_s22 = sadd.s32 1, %s756_s11 }
   0xf   : > { %s1044_s17 = scalar_select %p825_p8, 1, 0 }
  0x10   : > { %p578_p9 = pneg %p825_p8  ;;  %s23_s23 = ssub.s32 %s760_s12, %s841_s21 }
  0x11   : > { %s632_s26 = scalar_lea.hbm %s1037_s1, 2048 }
  0x12   : > { %p836_p11 = pnand %p578_p9, %p1039_p1  ;;  %p633_p12 = scmp.ne.s32.totalorder %s1037_s1, %s632_s26 }
  0x13   : > { %p639_p5 = scmp.lt.u32.totalorder %s632_s26, %s1037_s1 }
  0x14   : > { %p634_p13 = pneg %p836_p11 }
  0x16   : > { %p635_p0 = pnand %p634_p13, %p633_p12 }
  0x18   : > { %p636_p3 = pneg %p635_p0 }
  0x1a   : > { %p641_p7 = pnand %p639_p5, %p636_p3 }
  0x1c   : > { %644 = shalt.err (!%p641_p7)
}
  0x1d   : > { %s645_s3 = scalar_lea.vmem %s829_s19, 2048  ;;  %p653_p2 = scmp.lt.s32.totalorder %s829_s19, %s829_s19 }
  0x1e   : > { %p646_p9 = scmp.ne.s32.totalorder %s829_s19, %s645_s3  ;;  %p654_p6 = scmp.lt.s32.totalorder %s645_s3, %s645_s3 }
  0x20   : > { %p648_p10 = pnand %p646_p9, %p634_p13  ;;  %p655_p4 = por %p654_p6, %p653_p2 }
  0x22   : > { %p649_p1 = pneg %p648_p10 }
  0x24   : > { %p656_p8 = pnand %p655_p4, %p649_p1 }
  0x26   : > { %659 = shalt.err (!%p656_p8)
}
  0x27   : > { %s763_s4 = smov 128   ;;  %s764_s5 = smov 8  }
  0x28   : > { %581 = dma.hbm_to_vmem [thread:$0]  (!%p836_p11), %s1037_s1, 2048, %s829_s19, [#allocation6], %s763_s4, %s763_s4, %s764_s5  }
  0x29   : > { %p24_p1 = scmp.eq.s32.totalorder %s23_s23, 0  ;;  %p33_p2 = scmp.ne.s32.totalorder %s756_s11, %s752_s10 }
  0x2a   : > { %p34_p4 = scmp.eq.s32.totalorder %s760_s12, 0  ;;  %p591_p6 = scmp.lt.s32.totalorder %s760_s12, 2 }
  0x2b   : > { %s875_s8 = scalar_select %p24_p1, %s756_s11, %s26_s22  }
  0x2c   : > { %p35_p8 = por %p34_p4, %p33_p2  ;;  %p1046_p10 = scmp.eq.s32.totalorder %s806_s13, 1 }
  0x2d   : > { %s123_s18 = sand.u32 1, %s756_s11   ;;  %s493_s20 = sshll.u32 %s760_s12, 11 }
  0x2e   : > { %p879_p12 = por %p1046_p10, %p33_p2  ;;  %s466_s24 = sshll.u32 %s123_s18, 7 }
  0x2f   : > { %s888_s27 = scalar_lea.hbm %s1036_s0, %s493_s20  ;;  %s127_s19 = scalar_lea.vmem [#allocation2], %s466_s24 }
  0x30   : > { %s135_s22 = sshll.u32 %s127_s19, 4  ;;  %p890_p11 = pnand %p591_p6, %p35_p8  ;;  %s894_s22 = int_to_ptr.vmem [resolvable:$true] %s135_s22 }
  0x31   : > { %s896_s28 = scalar_lea.sflag [#allocation3], %s123_s18  ;;  %s660_s29 = scalar_lea.hbm %s888_s27, 2048 }
  0x32   : > { %p661_p13 = scmp.ne.s32.totalorder %s888_s27, %s660_s29  ;;  %p662_p0 = pneg %p890_p11 }
  0x33   : > { %s665_s6 = scalar_lea.hbm %s1036_s0, 4096  ;;  %p666_p7 = scmp.lt.u32.totalorder %s888_s27, %s1036_s0 }
  0x34   : > { %p663_p3 = pnand %p662_p0, %p661_p13  ;;  %p667_p9 = scmp.lt.u32.totalorder %s665_s6, %s660_s29 }
  0x35   : > { %p669_p2 = scmp.lt.u32.totalorder %s660_s29, %s888_s27 }
  0x36   : > { %p664_p5 = pneg %p663_p3  ;;  %p668_p1 = por %p667_p9, %p666_p7 }
  0x38   : > { %p670_p4 = por %p669_p2, %p668_p1 }
  0x3a   : > { %p671_p6 = pnand %p670_p4, %p664_p5 }
  0x3c   : > { %674 = shalt.err (!%p671_p6)
}
  0x3d   : > { %s675_s18 = scalar_lea.vmem %s894_s22, 2048  ;;  %s765_s24 = smov [#allocation2]  }
  0x3e   : > { %p676_p8 = scmp.ne.s32.totalorder %s894_s22, %s675_s18  ;;  %s680_s25 = sshll.u32 %s765_s24, 4  ;;  %s681_s25 = int_to_ptr.vmem [resolvable:$false] %s680_s25 }
  0x3f   : > { %s682_s26 = scalar_lea.vmem %s681_s25, 4096  ;;  %p683_p3 = scmp.lt.s32.totalorder %s894_s22, %s681_s25 }
  0x40   : > { %p678_p10 = pnand %p676_p8, %p662_p0  ;;  %p684_p7 = scmp.lt.s32.totalorder %s682_s26, %s675_s18 }
  0x42   : > { %p679_p13 = pneg %p678_p10  ;;  %p685_p9 = por %p684_p7, %p683_p3 }
  0x44   : > { %p686_p1 = pnand %p685_p9, %p679_p13 }
  0x46   : > { %689 = shalt.err (!%p686_p1)
}
  0x47   : > { %585 = dma.hbm_to_vmem [thread:$0]  (!%p890_p11), %s888_s27, 2048, %s894_s22, %s896_s28, %s763_s4, %s763_s4, %s764_s5  }
  0x48   : > { %p1049_p0 = scmp.ne.s32.totalorder %s1044_s17, 0 }
  0x49   : > { %s930_s19 = sand.u32 (!%p1049_p0), 1, %s752_s10   ;;  %p1050_p5 = scmp.ne.s32.totalorder (!%p1049_p0), %s1042_s15, 0 }
  0x4a   : > { %147 = sbr.rel (%p1049_p0) target bundleno = 345 (0x159), region = 28  ;;  %s471_s29 = sshll.u32 (!%p1049_p0), %s930_s19, 7 }
  0x4b   : > { %s150_s30 = scalar_lea.sflag (!%p1049_p0), [#allocation3], %s930_s19  ;;  %s934_s3 = scalar_lea.vmem (!%p1049_p0), [#allocation2], %s471_s29 }
  0x51   : > { %735 = dma.done.wait (%p1050_p5), %s150_s30, 2048  }
  0x52   : > { %737 = vsyncadd (%p1050_p5), %s150_s30, 4294965248  ;;  %p1051_p11 = scmp.eq.s32.totalorder %s806_s13, 0 }
  0x54   : > { %739 = dma.done.wait (%p1051_p11), [#allocation6], 2048   ;;  %p1052_p2 = pmov %p1051_p11 }
  0x55   : > { %v766_v0 = vmov 0.0|0.0   ;;  %vm767_vm0 = vmmov 0   ;;  %v768_v1 = vmov 0.0   ;;  %v281_v2 = vld [vmem:[#allocation5] sm:$0xff]  ;;  %v282_v3 = vld [vmem:[#allocation5 + $0x8] sm:$0xff]  ;;  %v283_v4 = vld [vmem:[#allocation5 + $0x10] sm:$0xff] }
  0x56   : > { %741 = vsyncadd (%p1052_p2), [#allocation6], 4294965248  ;;  %546 = vmatprep.subr.bf16.mxu0 %v766_v0  ;;  %543 = vmatprep.mubr.msk.f32.mxu0 %vm767_vm0, %v768_v1  ;;  %v547_v5 = vpack.c.bf16 %v282_v3, %v281_v2  ;;  %v284_v6 = vld [vmem:[#allocation5 + $0x18] sm:$0xff]  ;;  %v285_v7 = vld [vmem:[#allocation5 + $0x20] sm:$0xff]  ;;  %vm267_vm1 = vcmask 1040384   ;;  %vm269_vm2 = vcmask 1041408  }
  0x57   : > { %v550_v8 = vpack.c.bf16 %v284_v6, %v283_v4  ;;  %v286_v9 = vld [vmem:[#allocation5 + $0x28] sm:$0xff]  ;;  %v287_v10 = vld [vmem:[#allocation5 + $0x30] sm:$0xff]  ;;  %v288_v11 = vld [vmem:[#allocation5 + $0x38] sm:$0xff]  ;;  %vm271_vm3 = vcmask 1042432   ;;  %vm273_vm4 = vcmask 1043456   ;;  %vm275_vm5 = vcmask 1044480  }
  0x58   : > { %548 = vmatpush3.bf16.msra.mxu0 %v547_v5  ;;  %v946_v12 = vld [vmem:[#allocation5 + $0x40] sm:$0xff]  ;;  %v948_v13 = vld [vmem:[#allocation5 + $0x48] sm:$0xff]  ;;  %v950_v14 = vld [vmem:[#allocation5 + $0x50] sm:$0xff]  ;;  %v553_v22 = vpack.c.bf16 %v286_v9, %v285_v7  ;;  %v556_v27 = vpack.c.bf16 %v288_v11, %v287_v10  ;;  %vm277_vm6 = vcmask 1045504   ;;  %vm279_vm7 = vcmask 1046528   ;;  %s473_s15 = sshll.u32 %s930_s19, 3 }
  0x59   : > { %549 = vmatprep.subr.bf16.mxu0 %v766_v0  ;;  %v952_v15 = vld [vmem:[#allocation5 + $0x58] sm:$0xff]  ;;  %v179_v16 = vld [vmem:[%s934_s3] sm:$0xff]  ;;  %v180_v17 = vld [vmem:[%s934_s3 + $0x8] sm:$0xff]  ;;  %v559_v34 = vpack.c.bf16 %v948_v13, %v946_v12  ;;  %s177_s17 = scalar_lea.vmem [#allocation7], %s473_s15  ;;  %s489_s5 = sshll.u32 %s806_s13, 7 }
  0x5a   : > { %v181_v18 = vadd.f32 %v180_v17, %v179_v16  ;;  %v474_v19 = vld [vmem:[%s934_s3 + $0x10] sm:$0xff]  ;;  %v475_v20 = vld [vmem:[%s934_s3 + $0x18] sm:$0xff]  ;;  %v476_v21 = vld [vmem:[%s934_s3 + $0x20] sm:$0xff]  ;;  %v562_v35 = vpack.c.bf16 %v952_v15, %v950_v14  ;;  %s382_s4 = sshll.u32 %s177_s17, 4  ;;  %s994_s23 = scalar_lea.hbm %s1038_s2, %s489_s5  ;;  %s989_s4 = int_to_ptr.vmem [resolvable:$true] %s382_s4 }
  0x5b   : > { %v193_v23 = vadd.f32 %v475_v20, %v474_v19  ;;  %v477_v24 = vld [vmem:[%s934_s3 + $0x28] sm:$0xff]  ;;  %v478_v25 = vld [vmem:[%s934_s3 + $0x30] sm:$0xff]  ;;  %v479_v26 = vld [vmem:[%s934_s3 + $0x38] sm:$0xff]  ;;  %s369_s28 = scalar_lea.sflag [#allocation4], %s930_s19  ;;  %s690_s6 = scalar_lea.vmem %s989_s4, 128 }
  0x5c   : > { %551 = vmatpush3.bf16.msra.mxu0 %v550_v8  ;;  %v182_v28 = vrot.slane %v181_v18, 4  ;;  %v204_v29 = vadd.f32 %v477_v24, %v476_v21  ;;  %v215_v30 = vadd.f32 %v479_v26, %v478_v25  ;;  %v480_v31 = vld [vmem:[%s934_s3 + $0x40] sm:$0xff]  ;;  %v481_v32 = vld [vmem:[%s934_s3 + $0x48] sm:$0xff]  ;;  %v482_v33 = vld [vmem:[%s934_s3 + $0x50] sm:$0xff]  ;;  %p691_p4 = scmp.ne.s32.totalorder %s989_s4, %s690_s6  ;;  %s769_s13 = smov [#allocation7]  }
  0x5d   : > { %552 = vmatprep.subr.bf16.mxu0 %v766_v0  ;;  %v194_v36 = vrot.slane %v193_v23, 4  ;;  %v226_v37 = vadd.f32 %v481_v32, %v480_v31  ;;  %v483_v38 = vld [vmem:[%s934_s3 + $0x58] sm:$0xff]  ;;  %v484_v39 = vld [vmem:[%s934_s3 + $0x60] sm:$0xff]  ;;  %v485_v40 = vld [vmem:[%s934_s3 + $0x68] sm:$0xff]  ;;  %s694_s7 = sshll.u32 %s769_s13, 4  ;;  %s695_s7 = int_to_ptr.vmem [resolvable:$false] %s694_s7 }
  0x5e   : > { %v183_v41 = vadd.f32 %v182_v28, %v181_v18  ;;  %v205_v42 = vrot.slane %v204_v29, 4  ;;  %v216_v43 = vrot.slane %v215_v30, 4  ;;  %v237_v44 = vadd.f32 %v483_v38, %v482_v33  ;;  %v486_v45 = vld [vmem:[%s934_s3 + $0x70] sm:$0xff]  ;;  %v487_v46 = vld [vmem:[%s934_s3 + $0x78] sm:$0xff]  ;;  %v293_v18 = vld [vmem:[#allocation5 + $0x60] sm:$0xff]  ;;  %p692_p6 = pnand %p691_p4, %p879_p12  ;;  %s696_s20 = scalar_lea.vmem %s695_s7, 256 }
  0x5f   : > { %v195_v47 = vadd.f32 %v194_v36, %v193_v23  ;;  %v227_v48 = vrot.slane %v226_v37, 4  ;;  %v248_v49 = vadd.f32 %v485_v40, %v484_v39  ;;  %v259_v50 = vadd.f32 %v487_v46, %v486_v45  ;;  %v294_v19 = vld [vmem:[#allocation5 + $0x68] sm:$0xff]  ;;  %p697_p10 = scmp.lt.s32.totalorder %s989_s4, %s695_s7  ;;  %p698_p13 = scmp.lt.s32.totalorder %s696_s20, %s690_s6 }
  0x60   : > { %554 = vmatpush3.bf16.msra.mxu0 %v553_v22  ;;  %v184_v51 = vrot.slane %v183_v41, 2  ;;  %v206_v52 = vadd.f32 %v205_v42, %v204_v29  ;;  %v217_v53 = vadd.f32 %v216_v43, %v215_v30  ;;  %v238_v54 = vrot.slane %v237_v44, 4  ;;  %v296_v42 = vld [vmem:[#allocation5 + $0x78] sm:$0xff]  ;;  %p693_p8 = pneg %p692_p6 }
  0x61   : > { %555 = vmatprep.subr.bf16.mxu0 %v766_v0  ;;  %v196_v55 = vrot.slane %v195_v47, 2  ;;  %v228_v56 = vadd.f32 %v227_v48, %v226_v37  ;;  %v249_v57 = vrot.slane %v248_v49, 4  ;;  %v260_v58 = vrot.slane %v259_v50, 4  ;;  %p699_p3 = por %p698_p13, %p697_p10 }
  0x62   : > { %v185_v59 = vadd.f32 %v184_v51, %v183_v41  ;;  %v207_v60 = vrot.slane %v206_v52, 2  ;;  %v218_v61 = vrot.slane %v217_v53, 2  ;;  %v239_v62 = vadd.f32 %v238_v54, %v237_v44  ;;  %v295_v41 = vld [vmem:[#allocation5 + $0x70] sm:$0xff] }
  0x63   : > { %v197_v63 = vadd.f32 %v196_v55, %v195_v47  ;;  %v229_v1 = vrot.slane %v228_v56, 2  ;;  %v250_v2 = vadd.f32 %v249_v57, %v248_v49  ;;  %v261_v3 = vadd.f32 %v260_v58, %v259_v50  ;;  %p700_p7 = pnand %p699_p3, %p693_p8 }
  0x64   : > { %557 = vmatpush3.bf16.msra.mxu0 %v556_v27  ;;  %v186_v4 = vrot.slane %v185_v59, 1  ;;  %v208_v5 = vadd.f32 %v207_v60, %v206_v52  ;;  %v219_v6 = vadd.f32 %v218_v61, %v217_v53  ;;  %v240_v7 = vrot.slane %v239_v62, 2 }
  0x65   : > { %558 = vmatprep.subr.bf16.mxu0 %v766_v0  ;;  %v198_v8 = vrot.slane %v197_v63, 1  ;;  %v230_v9 = vadd.f32 %v229_v1, %v228_v56  ;;  %v251_v10 = vrot.slane %v250_v2, 2  ;;  %v262_v11 = vrot.slane %v261_v3, 2 }
  0x66   : > { %v187_v12 = vadd.f32 %v186_v4, %v185_v59  ;;  %v209_v13 = vrot.slane %v208_v5, 1  ;;  %v220_v16 = vrot.slane %v219_v6, 1  ;;  %v241_v17 = vadd.f32 %v240_v7, %v239_v62 }
  0x67   : > { %v199_v20 = vadd.f32 %v198_v8, %v197_v63  ;;  %v231_v21 = vrot.slane %v230_v9, 1  ;;  %v252_v22 = vadd.f32 %v251_v10, %v250_v2  ;;  %v263_v23 = vadd.f32 %v262_v11, %v261_v3 }
  0x68   : > { %560 = vmatpush3.bf16.msra.mxu0 %v559_v34  ;;  %v189_v24 = vmul.f32 0.0625, %v187_v12  ;;  %v210_v25 = vadd.f32 %v209_v13, %v208_v5  ;;  %v221_v26 = vadd.f32 %v220_v16, %v219_v6  ;;  %v242_v27 = vrot.slane %v241_v17, 1 }
  0x69   : > { %561 = vmatprep.subr.bf16.mxu0 %v766_v0  ;;  %v200_v28 = vmul.f32 0.0625, %v199_v20  ;;  %v232_v29 = vadd.f32 %v231_v21, %v230_v9  ;;  %v253_v30 = vrot.slane %v252_v22, 1  ;;  %v264_v31 = vrot.slane %v263_v23, 1 }
  0x6a   : > { %v565_v32 = vpack.c.bf16 %v294_v19, %v293_v18  ;;  %v211_v33 = vmul.f32 0.0625, %v210_v25  ;;  %v222_v36 = vmul.f32 0.0625, %v221_v26  ;;  %v243_v34 = vadd.f32 %v242_v27, %v241_v17 }
  0x6b   : > { %v233_v37 = vmul.f32 0.0625, %v232_v29  ;;  %v254_v38 = vadd.f32 %v253_v30, %v252_v22  ;;  %v265_v39 = vadd.f32 %v264_v31, %v263_v23  ;;  %v268_v40 = vsel %vm267_vm1, %v189_v24, %v200_v28 }
  0x6c   : > { %563 = vmatpush3.bf16.msra.mxu0 %v562_v35  ;;  %v244_v43 = vmul.f32 0.0625, %v243_v34  ;;  %v270_v44 = vsel %vm269_vm2, %v268_v40, %v211_v33  ;;  %v568_v15 = vpack.c.bf16 %v296_v42, %v295_v41 }
  0x6d   : > { %564 = vmatprep.subr.bf16.mxu0 %v766_v0  ;;  %v255_v45 = vmul.f32 0.0625, %v254_v38  ;;  %v272_v46 = vsel %vm271_vm3, %v270_v44, %v222_v36  ;;  %v266_v35 = vmul.f32 0.0625, %v265_v39 }
  0x6e   : > { %v274_v14 = vsel %vm273_vm4, %v272_v46, %v233_v37 }
  0x6f   : > { %v276_v47 = vsel %vm275_vm5, %v274_v14, %v244_v43 }
  0x70   : > { %566 = vmatpush3.bf16.msra.mxu0 %v565_v32  ;;  %v278_v48 = vsel %vm277_vm6, %v276_v47, %v255_v45 }
  0x71   : > { %567 = vmatprep.subr.bf16.mxu0 %v766_v0  ;;  %v280_v49 = vsel %vm279_vm7, %v278_v48, %v266_v35 }
  0x74   : > { %569 = vmatpush3.bf16.msra.mxu0 %v568_v15 }
  0x77   : > { %544 = vmatmul.mubr.f32.vlgmr.msra.gmra.mrb[0].mxu0 %v280_v49 }
 0x14a   : > { %v363_v0 = vpop.f32.mrb[0].mxu0 }
 0x14b   : > { %367 = vst [vmem:[%s177_s17] sm:$0xff] %v363_v0  ;;  %v545_v50 = vpop.f32.mrb[1].mxu0 }
 0x14c   : > { %703 = shalt.err (!%p700_p7)
}
 0x14d   : > { %s704_s18 = scalar_lea.hbm %s994_s23, 128  ;;  %s708_s26 = scalar_lea.hbm %s1038_s2, 256 }
 0x14e   : > { %p705_p9 = scmp.ne.s32.totalorder %s994_s23, %s704_s18  ;;  %p709_p5 = scmp.lt.u32.totalorder %s994_s23, %s1038_s2 }
 0x14f   : > { %p710_p11 = scmp.lt.u32.totalorder %s708_s26, %s704_s18  ;;  %p712_p4 = scmp.lt.u32.totalorder %s704_s18, %s994_s23 }
 0x150   : > { %p706_p1 = pnand %p705_p9, %p879_p12 }
 0x151   : > { %p711_p2 = por %p710_p11, %p709_p5 }
 0x152   : > { %p707_p0 = pneg %p706_p1 }
 0x153   : > { %p713_p6 = por %p712_p4, %p711_p2 }
 0x155   : > { %p714_p8 = pnand %p713_p6, %p707_p0 }
 0x157   : > { %717 = shalt.err (!%p714_p8)
}
 0x158   : > { %576 = dma.vmem_to_hbm [thread:$0]  (%p879_p12), %s989_s4, 128, %s994_s23, %s369_s28  }
 0x159 PF: > { %s394_s30 = sand.u32 1, %s748_s9   ;;  %p1053_p10 = scmp.ne.s32.totalorder %s1043_s16, 0 }
 0x15a   : > { %p1054_p13 = scmp.ge.s32.totalorder %s760_s12, 2  ;;  %s395_s3 = scalar_lea.sflag [#allocation4], %s394_s30 }
 0x15c   : > { %p587_p3 = pnand %p1054_p13, %p1053_p10 }
 0x15e   : > { %743 = dma.done.wait (!%p587_p3), %s395_s3, 128  }
 0x15f   : > { %745 = vsyncadd (!%p587_p3), %s395_s3, 4294967168  ;;  %p16_p7 = scmp.ge.s32.totalorder %s841_s21, 4   ;;  %s1055_s9 = smov %s752_s10 }
 0x160   : > { %s1056_s10 = smov %s756_s11  ;;  %s1057_s11 = smov %s875_s8 }
 0x161   : > { %s1058_s12 = smov %s841_s21  ;;  %18 = sbr.rel (!%p16_p7) target bundleno = 6 (0x6), region = 84 }
 0x168   :  { %400 = vsyncpa [#allocation3], 1 }
 0x169   :  { %402 = vsyncpa [#allocation3 + $0x1], 1 }
 0x16a   :  { %403 = vsyncpa [#allocation6], 1 }
 0x16b   :  { %404 = vsyncpa [#allocation4], 1 }
 0x16c   :  { %406 = vsyncpa [#allocation4 + $0x1], 1 }

</bundles_post_ra>
